<compile_context>
chip_gen: v7x
topology: tpu7x:2x2x1
jax: 0.10.0
libtpu: 0.0.40
codegen_flags: <defaults>
</compile_context>

<pallas_src>
import functools
import math

import jax
import jax.numpy as jnp
from jax import lax
from jax.experimental import pallas as pl
from jax.experimental.pallas import tpu as pltpu


# ----------------------------- fused kernel ---------------------------------
def _bottleneck_kernel(x_ref, w1_ref, s1_ref, b1_ref,
                       w2_ref, s2_ref, b2_ref,
                       w3_ref, s3_ref, b3_ref,
                       o_ref,
                       pad_ref, patch_ref, acc_ref,
                       *, H, W, GP):
    # x_ref    : (H*W, Cin) f32   -- conv1 input AND the identity residual
    # w1_ref   : (P, Cin, GP) bf16            (resident, indexed by pack)
    # s1/b1    : (P, 1, GP)  f32
    # w2_ref   : (P, 9*GP, GP) bf16 block-diagonal im2col weight
    # s2/b2    : (P, 1, GP)  f32
    # w3_ref   : (P, GP, Cout) bf16
    # s3/b3    : (1, Cout)   f32
    # o_ref    : (H*W, Cout) f32
    # pad_ref  : (H+2, W+2, GP) bf16 scratch (halo buffer)
    # patch_ref: (H*W, 9*GP) bf16 scratch (im2col)
    # acc_ref  : (H*W, Cout) f32 scratch (conv3 accumulator over packs)
    p = pl.program_id(1)
    last_p = pl.num_programs(1) - 1
    HW = H * W

    @pl.when(p == 0)
    def _():
        acc_ref[...] = jnp.zeros_like(acc_ref)

    # ---- conv1 (1x1, this pack's GP output channels) + BN1 + ReLU ----------
    x = x_ref[...]                                           # (HW, Cin) f32
    a1 = jnp.dot(x.astype(jnp.bfloat16), w1_ref[p],
                 preferred_element_type=jnp.float32)         # (HW, GP)
    a1 = jnp.maximum(a1 * s1_ref[p] + b1_ref[p], 0.0)

    # ---- build zero-padded (halo=1) activation in VMEM ---------------------
    # Interior + left/right zero columns in one contiguous store; top/bottom
    # zero rows as two small slab stores (no full-buffer re-zero).
    zcol = jnp.zeros((H, 1, GP), jnp.float32)
    body = jnp.concatenate([zcol, a1.reshape(H, W, GP), zcol], axis=1)
    pad_ref[1:H + 1, :, :] = body.astype(jnp.bfloat16)
    zrow = jnp.zeros((1, W + 2, GP), jnp.bfloat16)
    pad_ref[0:1, :, :] = zrow
    pad_ref[H + 1:H + 2, :, :] = zrow

    # ---- grouped 3x3 conv as ONE im2col dot (K = 9*GP) ----------------------
    for t in range(9):                                       # static unroll
        ky, kx = t // 3, t % 3
        patch_ref[:, t * GP:(t + 1) * GP] = (
            pad_ref[ky:ky + H, kx:kx + W, :].reshape(HW, GP))
    h = jnp.dot(patch_ref[...], w2_ref[p],
                preferred_element_type=jnp.float32)          # (HW, GP)
    h = jnp.maximum(h * s2_ref[p] + b2_ref[p], 0.0)          # BN2 + ReLU

    # ---- this pack's contribution to conv3 (1x1), accumulated over packs ---
    acc_ref[...] += jnp.dot(h.astype(jnp.bfloat16), w3_ref[p],
                            preferred_element_type=jnp.float32)

    # ---- BN3 + residual + ReLU on the last pack -----------------------------
    @pl.when(p == last_p)
    def _():
        y = acc_ref[...] * s3_ref[...] + b3_ref[...] + x_ref[...]
        o_ref[...] = jnp.maximum(y, 0.0).astype(o_ref.dtype)


# --------------------------- parameters / folding ---------------------------
def init_params(key, inplanes, planes, baseWidth, cardinality):
    """Random parameters in the PyTorch module's native layouts (f32)."""
    D = int(math.floor(planes * (baseWidth / 64)))
    C = cardinality
    DC = D * C
    Cout = planes * 4  # expansion = 4
    ks = jax.random.split(key, 15)

    def bn(kg, kb, km, kv, ch):
        gamma = jax.random.uniform(kg, (ch,), jnp.float32, 0.5, 1.5)
        beta = 0.1 * jax.random.normal(kb, (ch,), jnp.float32)
        mean = 0.1 * jax.random.normal(km, (ch,), jnp.float32)
        var = jax.random.uniform(kv, (ch,), jnp.float32, 0.5, 1.5)
        scale = gamma * lax.rsqrt(var + 1e-5)
        bias = beta - mean * scale
        return scale, bias

    p = {}
    p['w1'] = 0.05 * jax.random.normal(ks[0], (DC, inplanes, 1, 1), jnp.float32)   # OIHW
    p['w2'] = 0.05 * jax.random.normal(ks[1], (DC, D, 3, 3), jnp.float32)          # grouped OIHW
    p['w3'] = 0.05 * jax.random.normal(ks[2], (Cout, DC, 1, 1), jnp.float32)       # OIHW
    p['s1'], p['b1'] = bn(ks[3], ks[4], ks[5], ks[6], DC)
    p['s2'], p['b2'] = bn(ks[7], ks[8], ks[9], ks[10], DC)
    p['s3'], p['b3'] = bn(ks[11], ks[12], ks[13], ks[14], Cout)
    return p


def prepare_kernel_params(p, cardinality):
    """One-time layout/dtype folding + group packing (outside the jitted fwd)."""
    C = cardinality
    DC, Cin = p['w1'].shape[:2]
    D = DC // C
    Cout = p['w3'].shape[0]

    # Pack G groups (GP = G*D lanes) per MXU tile; P packs total.
    G = max(1, min(C, max(1, 128 // max(D, 1))))
    while C % G != 0:
        G -= 1
    GP = G * D
    P = C // G

    # conv1 weight: OIHW (DC, Cin, 1, 1) -> (P, Cin, GP) bf16
    w1 = p['w1'][:, :, 0, 0].T                                   # (Cin, DC)
    w1 = jnp.asarray(w1.reshape(Cin, P, GP).transpose(1, 0, 2), jnp.bfloat16)

    # conv2 grouped weight -> per-pack block-diagonal im2col weight
    # (P, 9*GP, GP): row index = tap*GP + local_in, col = local_out.
    w2 = p['w2'].reshape(C, D, D, 3, 3)                          # (g, dout, din, ky, kx)
    w2 = jnp.transpose(w2, (0, 3, 4, 2, 1)).reshape(P, G, 9, D, D)  # (p, j, t, din, dout)
    bd = jnp.zeros((P, 9, GP, GP), jnp.float32)
    for j in range(G):
        bd = bd.at[:, :, j * D:(j + 1) * D, j * D:(j + 1) * D].set(w2[:, j])
    w2p = jnp.asarray(bd.reshape(P, 9 * GP, GP), jnp.bfloat16)

    # conv3 weight: OIHW (Cout, DC, 1, 1) -> (P, GP, Cout) bf16
    w3 = p['w3'][:, :, 0, 0].T                                   # (DC, Cout)
    w3 = jnp.asarray(w3.reshape(P, GP, Cout), jnp.bfloat16)

    kparams = dict(
        w1=w1, w2=w2p, w3=w3,
        s1=p['s1'].reshape(P, 1, GP), b1=p['b1'].reshape(P, 1, GP),
        s2=p['s2'].reshape(P, 1, GP), b2=p['b2'].reshape(P, 1, GP),
        s3=p['s3'][None], b3=p['b3'][None],                      # (1, Cout)
    )
    dims = dict(C=C, D=D, DC=DC, Cin=Cin, Cout=Cout, G=G, GP=GP, P=P)
    return kparams, dims


# --------------------------------- wrapper -----------------------------------
def bottleneck_forward(x_nchw, kp, dims, stride=1):
    GP, P, Cout = dims['GP'], dims['P'], dims['Cout']
    N, Cin, H, W = x_nchw.shape
    if stride != 1 or Cin != Cout:
        # TODO(synk): stride>1 / downsample module (non-identity residual).
        raise NotImplementedError("identity-residual path requires stride==1 "
                                  "and inplanes == planes*expansion")
    HW = H * W

    # NCHW -> NHWC, flatten spatial (the transpose rewrites the array anyway).
    x = jnp.transpose(x_nchw, (0, 2, 3, 1)).reshape(N, HW, Cin)

    # Right-size the VMEM budget from the actual footprint (+50% / 4 MiB slack).
    wbytes = sum(int(v.size) * v.dtype.itemsize for v in kp.values())
    io_bytes = 2 * (HW * Cin * 4) + 2 * (HW * Cout * 4)          # double-buffered
    scratch_bytes = ((H + 2) * (W + 2) * GP * 2 + HW * 9 * GP * 2
                     + HW * Cout * 4)
    vmem_limit = int(1.5 * (wbytes + io_bytes + scratch_bytes)) + (4 << 20)
    vmem_limit = max(16 << 20, min(vmem_limit, 100 << 20))

    const3 = lambda n, p: (0, 0, 0)
    out = pl.pallas_call(
        functools.partial(_bottleneck_kernel, H=H, W=W, GP=GP),
        out_shape=jax.ShapeDtypeStruct((N, HW, Cout), jnp.float32),
        grid_spec=pltpu.PrefetchScalarGridSpec(
            num_scalar_prefetch=0,
            grid=(N, P),                   # batch parallel, packs = reduction
            in_specs=[
                pl.BlockSpec((None, HW, Cin), lambda n, p: (n, 0, 0)),
                pl.BlockSpec((P, Cin, GP), const3),          # resident weights
                pl.BlockSpec((P, 1, GP), const3),
                pl.BlockSpec((P, 1, GP), const3),
                pl.BlockSpec((P, 9 * GP, GP), const3),
                pl.BlockSpec((P, 1, GP), const3),
                pl.BlockSpec((P, 1, GP), const3),
                pl.BlockSpec((P, GP, Cout), const3),
                pl.BlockSpec((1, Cout), lambda n, p: (0, 0)),
                pl.BlockSpec((1, Cout), lambda n, p: (0, 0)),
            ],
            out_specs=pl.BlockSpec((None, HW, Cout), lambda n, p: (n, 0, 0)),
            scratch_shapes=[
                pltpu.VMEM((H + 2, W + 2, GP), jnp.bfloat16),   # halo buffer
                pltpu.VMEM((HW, 9 * GP), jnp.bfloat16),         # im2col patch
                pltpu.VMEM((HW, Cout), jnp.float32),            # conv3 acc
            ],
        ),
        compiler_params=pltpu.CompilerParams(
            dimension_semantics=("parallel", "arbitrary"),
            vmem_limit_bytes=vmem_limit),
    )(x, kp['w1'], kp['s1'], kp['b1'], kp['w2'], kp['s2'], kp['b2'],
      kp['w3'], kp['s3'], kp['b3'])

    out = out.reshape(N, H, W, Cout)
    return jnp.transpose(out, (0, 3, 1, 2))          # NHWC -> NCHW


# -------------------------------- reference ----------------------------------
def reference_nchw(x, p, cardinality, stride=1):
    def conv(x, w, stride=1, padding=0, groups=1):
        return lax.conv_general_dilated(
            x, w, (stride, stride), [(padding, padding)] * 2,
            dimension_numbers=('NCHW', 'OIHW', 'NCHW'),
            feature_group_count=groups)

    def bn(y, s, b):
        return y * s[None, :, None, None] + b[None, :, None, None]

    out = jax.nn.relu(bn(conv(x, p['w1']), p['s1'], p['b1']))
    out = jax.nn.relu(bn(conv(out, p['w2'], stride=stride, padding=1,
                              groups=cardinality), p['s2'], p['b2']))
    out = bn(conv(out, p['w3']), p['s3'], p['b3'])
    return jax.nn.relu(out + x)


if __name__ == "__main__":
    key = jax.random.PRNGKey(0)
    # Bottleneck(inplanes=32, planes=8, baseWidth=64, cardinality=4, stride=1)
    # -> D=8, D*C=32, out channels = planes*4 = 32 (identity residual valid).
    N, inplanes, H, W = 2, 32, 8, 8
    planes, baseWidth, cardinality = 8, 64, 4

    kx, kparam_key = jax.random.split(key)
    x = jax.random.normal(kx, (N, inplanes, H, W), jnp.float32)
    torch_params = init_params(kparam_key, inplanes, planes, baseWidth, cardinality)
    kparams, dims = prepare_kernel_params(torch_params, cardinality)

    fwd = jax.jit(lambda xx, kp: bottleneck_forward(xx, kp, dims))
    out = jax.block_until_ready(fwd(x, kparams))

    ref = reference_nchw(x, torch_params, cardinality)
    assert out.shape == ref.shape, (out.shape, ref.shape)
    max_err = float(jnp.max(jnp.abs(out - ref)))
    # bf16 MXU inputs with f32 accumulation -> looser tolerance than pure f32.
    assert jnp.allclose(out, ref, atol=2e-2, rtol=2e-2), max_err
    print("KERNEL_OK")
</pallas_src>

<mosaic_0001>
module attributes {stable_mosaic.version = 11 : i64} {
  func.func @_bottleneck_kernel(%arg0: i32, %arg1: i32, %arg2: memref<1x64x32xf32, #tpu.memory_space<vmem>>, %arg3: memref<1x32x32xbf16, #tpu.memory_space<vmem>>, %arg4: memref<1x1x32xf32, #tpu.memory_space<vmem>>, %arg5: memref<1x1x32xf32, #tpu.memory_space<vmem>>, %arg6: memref<1x288x32xbf16, #tpu.memory_space<vmem>>, %arg7: memref<1x1x32xf32, #tpu.memory_space<vmem>>, %arg8: memref<1x1x32xf32, #tpu.memory_space<vmem>>, %arg9: memref<1x32x32xbf16, #tpu.memory_space<vmem>>, %arg10: memref<1x32xf32, #tpu.memory_space<vmem>>, %arg11: memref<1x32xf32, #tpu.memory_space<vmem>>, %arg12: memref<1x64x32xf32, #tpu.memory_space<vmem>>, %arg13: memref<10x10x32xbf16, #tpu.memory_space<vmem>>, %arg14: memref<64x288xbf16, #tpu.memory_space<vmem>>, %arg15: memref<64x32xf32, #tpu.memory_space<vmem>>) attributes {dimension_semantics = [#tpu.dimension_semantics<parallel>, #tpu.dimension_semantics<arbitrary>], iteration_bounds = array<i64: 2, 1>, scalar_prefetch = 0 : i64, scratch_operands = 3 : i64, tpu.core_type = #tpu.core_type<tc>, window_params = [{transform_indices = @transform_0, window_bounds = array<i64: 1, 64, 32>}, {pipeline_mode = #tpu.pipeline_mode<synchronous>, transform_indices = @transform_1, window_bounds = array<i64: 1, 32, 32>}, {pipeline_mode = #tpu.pipeline_mode<synchronous>, transform_indices = @transform_2, window_bounds = array<i64: 1, 1, 32>}, {pipeline_mode = #tpu.pipeline_mode<synchronous>, transform_indices = @transform_3, window_bounds = array<i64: 1, 1, 32>}, {pipeline_mode = #tpu.pipeline_mode<synchronous>, transform_indices = @transform_4, window_bounds = array<i64: 1, 288, 32>}, {pipeline_mode = #tpu.pipeline_mode<synchronous>, transform_indices = @transform_5, window_bounds = array<i64: 1, 1, 32>}, {pipeline_mode = #tpu.pipeline_mode<synchronous>, transform_indices = @transform_6, window_bounds = array<i64: 1, 1, 32>}, {pipeline_mode = #tpu.pipeline_mode<synchronous>, transform_indices = @transform_7, window_bounds = array<i64: 1, 32, 32>}, {pipeline_mode = #tpu.pipeline_mode<synchronous>, transform_indices = @transform_8, window_bounds = array<i64: 1, 32>}, {pipeline_mode = #tpu.pipeline_mode<synchronous>, transform_indices = @transform_9, window_bounds = array<i64: 1, 32>}, {transform_indices = @transform_10, window_bounds = array<i64: 1, 64, 32>}]} {
    %c0_i32 = arith.constant 0 : i32
    %0 = arith.cmpi eq, %arg1, %c0_i32 : i32
    %1 = arith.extui %0 : i1 to i32
    %c0_i32_0 = arith.constant 0 : i32
    %2 = arith.cmpi ne, %1, %c0_i32_0 : i32
    scf.if %2 {
      %cst_74 = arith.constant 0.000000e+00 : f32
      %85 = vector.broadcast %cst_74 : f32 to vector<64x32xf32>
      %c0_75 = arith.constant 0 : index
      %c0_76 = arith.constant 0 : index
      %86 = vector.load %arg15[%c0_75, %c0_76] : memref<64x32xf32, #tpu.memory_space<vmem>>, vector<64x32xf32>
      tpu.vector_store %arg15[%c0_75, %c0_76], %85 {strides = array<i32>} : memref<64x32xf32, #tpu.memory_space<vmem>>, vector<64x32xf32>,
    } else {
    }
    %c0 = arith.constant 0 : index
    %c0_1 = arith.constant 0 : index
    %c0_2 = arith.constant 0 : index
    %3 = vector.load %arg2[%c0, %c0_1, %c0_2] : memref<1x64x32xf32, #tpu.memory_space<vmem>>, vector<1x64x32xf32>
    %4 = vector.shape_cast %3 : vector<1x64x32xf32> to vector<64x32xf32>
    %5 = arith.truncf %4 : vector<64x32xf32> to vector<64x32xbf16>
    %6 = arith.index_cast %arg1 : i32 to index
    %c0_3 = arith.constant 0 : index
    %c0_4 = arith.constant 0 : index
    %7 = vector.load %arg3[%6, %c0_3, %c0_4] : memref<1x32x32xbf16, #tpu.memory_space<vmem>>, vector<1x32x32xbf16>
    %8 = vector.shape_cast %7 : vector<1x32x32xbf16> to vector<32x32xbf16>
    %cst = arith.constant dense<0.000000e+00> : vector<64x32xf32>
    %9 = tpu.matmul %5, %8, %cst {dimension_numbers = #tpu.dot_dimension_numbers<[1], [0], [0], [1], [0, 0, 1, 1], [], []>} : vector<64x32xbf16>, vector<32x32xbf16>, vector<64x32xf32> -> vector<64x32xf32>
    %10 = arith.index_cast %arg1 : i32 to index
    %c0_5 = arith.constant 0 : index
    %c0_6 = arith.constant 0 : index
    %11 = vector.load %arg4[%10, %c0_5, %c0_6] : memref<1x1x32xf32, #tpu.memory_space<vmem>>, vector<1x1x32xf32>
    %12 = vector.shape_cast %11 : vector<1x1x32xf32> to vector<1x32xf32>
    %13 = vector.broadcast %12 : vector<1x32xf32> to vector<64x32xf32>
    %14 = arith.mulf %9, %13 : vector<64x32xf32>
    %15 = arith.index_cast %arg1 : i32 to index
    %c0_7 = arith.constant 0 : index
    %c0_8 = arith.constant 0 : index
    %16 = vector.load %arg5[%15, %c0_7, %c0_8] : memref<1x1x32xf32, #tpu.memory_space<vmem>>, vector<1x1x32xf32>
    %17 = vector.shape_cast %16 : vector<1x1x32xf32> to vector<1x32xf32>
    %18 = vector.broadcast %17 : vector<1x32xf32> to vector<64x32xf32>
    %19 = arith.addf %14, %18 : vector<64x32xf32>
    %cst_9 = arith.constant 0.000000e+00 : f32
    %20 = vector.broadcast %cst_9 : f32 to vector<64x32xf32>
    %21 = arith.maximumf %19, %20 : vector<64x32xf32>
    %cst_10 = arith.constant 0.000000e+00 : f32
    %22 = vector.broadcast %cst_10 : f32 to vector<8x1x32xf32>
    %23 = vector.shape_cast %21 : vector<64x32xf32> to vector<8x8x32xf32>
    %24 = tpu.concatenate %22, %23, %22 in 1 : vector<8x1x32xf32>, vector<8x8x32xf32>, vector<8x1x32xf32> -> vector<8x10x32xf32>
    %25 = arith.truncf %24 : vector<8x10x32xf32> to vector<8x10x32xbf16>
    %c1 = arith.constant 1 : index
    %c0_11 = arith.constant 0 : index
    %c0_12 = arith.constant 0 : index
    %26 = vector.load %arg13[%c1, %c0_11, %c0_12] : memref<10x10x32xbf16, #tpu.memory_space<vmem>>, vector<8x10x32xbf16>
    tpu.vector_store %arg13[%c1, %c0_11, %c0_12], %25 {strides = array<i32>} : memref<10x10x32xbf16, #tpu.memory_space<vmem>>, vector<8x10x32xbf16>,
    %cst_13 = arith.constant 0.000000e+00 : bf16
    %27 = vector.broadcast %cst_13 : bf16 to vector<1x10x32xbf16>
    %c0_14 = arith.constant 0 : index
    %c0_15 = arith.constant 0 : index
    %c0_16 = arith.constant 0 : index
    %28 = vector.load %arg13[%c0_14, %c0_15, %c0_16] : memref<10x10x32xbf16, #tpu.memory_space<vmem>>, vector<1x10x32xbf16>
    tpu.vector_store %arg13[%c0_14, %c0_15, %c0_16], %27 {strides = array<i32>} : memref<10x10x32xbf16, #tpu.memory_space<vmem>>, vector<1x10x32xbf16>,
    %c9 = arith.constant 9 : index
    %c0_17 = arith.constant 0 : index
    %c0_18 = arith.constant 0 : index
    %29 = vector.load %arg13[%c9, %c0_17, %c0_18] : memref<10x10x32xbf16, #tpu.memory_space<vmem>>, vector<1x10x32xbf16>
    tpu.vector_store %arg13[%c9, %c0_17, %c0_18], %27 {strides = array<i32>} : memref<10x10x32xbf16, #tpu.memory_space<vmem>>, vector<1x10x32xbf16>,
    %c0_19 = arith.constant 0 : index
    %c0_20 = arith.constant 0 : index
    %c0_21 = arith.constant 0 : index
    %30 = vector.load %arg13[%c0_19, %c0_20, %c0_21] : memref<10x10x32xbf16, #tpu.memory_space<vmem>>, vector<8x8x32xbf16>
    %31 = vector.shape_cast %30 : vector<8x8x32xbf16> to vector<64x32xbf16>
    %c0_22 = arith.constant 0 : index
    %c0_23 = arith.constant 0 : index
    %32 = vector.load %arg14[%c0_22, %c0_23] : memref<64x288xbf16, #tpu.memory_space<vmem>>, vector<64x32xbf16>
    tpu.vector_store %arg14[%c0_22, %c0_23], %31 {strides = array<i32>} : memref<64x288xbf16, #tpu.memory_space<vmem>>, vector<64x32xbf16>,
    %c0_24 = arith.constant 0 : index
    %c1_25 = arith.constant 1 : index
    %c0_26 = arith.constant 0 : index
    %33 = vector.load %arg13[%c0_24, %c1_25, %c0_26] : memref<10x10x32xbf16, #tpu.memory_space<vmem>>, vector<8x8x32xbf16>
    %34 = vector.shape_cast %33 : vector<8x8x32xbf16> to vector<64x32xbf16>
    %c0_27 = arith.constant 0 : index
    %c32 = arith.constant 32 : index
    %35 = vector.load %arg14[%c0_27, %c32] : memref<64x288xbf16, #tpu.memory_space<vmem>>, vector<64x32xbf16>
    tpu.vector_store %arg14[%c0_27, %c32], %34 {strides = array<i32>} : memref<64x288xbf16, #tpu.memory_space<vmem>>, vector<64x32xbf16>,
    %c0_28 = arith.constant 0 : index
    %c2 = arith.constant 2 : index
    %c0_29 = arith.constant 0 : index
    %36 = vector.load %arg13[%c0_28, %c2, %c0_29] : memref<10x10x32xbf16, #tpu.memory_space<vmem>>, vector<8x8x32xbf16>
    %37 = vector.shape_cast %36 : vector<8x8x32xbf16> to vector<64x32xbf16>
    %c0_30 = arith.constant 0 : index
    %c64 = arith.constant 64 : index
    %38 = vector.load %arg14[%c0_30, %c64] : memref<64x288xbf16, #tpu.memory_space<vmem>>, vector<64x32xbf16>
    tpu.vector_store %arg14[%c0_30, %c64], %37 {strides = array<i32>} : memref<64x288xbf16, #tpu.memory_space<vmem>>, vector<64x32xbf16>,
    %c1_31 = arith.constant 1 : index
    %c0_32 = arith.constant 0 : index
    %c0_33 = arith.constant 0 : index
    %39 = vector.load %arg13[%c1_31, %c0_32, %c0_33] : memref<10x10x32xbf16, #tpu.memory_space<vmem>>, vector<8x8x32xbf16>
    %40 = vector.shape_cast %39 : vector<8x8x32xbf16> to vector<64x32xbf16>
    %c0_34 = arith.constant 0 : index
    %c96 = arith.constant 96 : index
    %41 = vector.load %arg14[%c0_34, %c96] : memref<64x288xbf16, #tpu.memory_space<vmem>>, vector<64x32xbf16>
    tpu.vector_store %arg14[%c0_34, %c96], %40 {strides = array<i32>} : memref<64x288xbf16, #tpu.memory_space<vmem>>, vector<64x32xbf16>,
    %c1_35 = arith.constant 1 : index
    %c1_36 = arith.constant 1 : index
    %c0_37 = arith.constant 0 : index
    %42 = vector.load %arg13[%c1_35, %c1_36, %c0_37] : memref<10x10x32xbf16, #tpu.memory_space<vmem>>, vector<8x8x32xbf16>
    %43 = vector.shape_cast %42 : vector<8x8x32xbf16> to vector<64x32xbf16>
    %c0_38 = arith.constant 0 : index
    %c128 = arith.constant 128 : index
    %44 = vector.load %arg14[%c0_38, %c128] : memref<64x288xbf16, #tpu.memory_space<vmem>>, vector<64x32xbf16>
    tpu.vector_store %arg14[%c0_38, %c128], %43 {strides = array<i32>} : memref<64x288xbf16, #tpu.memory_space<vmem>>, vector<64x32xbf16>,
    %c1_39 = arith.constant 1 : index
    %c2_40 = arith.constant 2 : index
    %c0_41 = arith.constant 0 : index
    %45 = vector.load %arg13[%c1_39, %c2_40, %c0_41] : memref<10x10x32xbf16, #tpu.memory_space<vmem>>, vector<8x8x32xbf16>
    %46 = vector.shape_cast %45 : vector<8x8x32xbf16> to vector<64x32xbf16>
    %c0_42 = arith.constant 0 : index
    %c160 = arith.constant 160 : index
    %47 = vector.load %arg14[%c0_42, %c160] : memref<64x288xbf16, #tpu.memory_space<vmem>>, vector<64x32xbf16>
    tpu.vector_store %arg14[%c0_42, %c160], %46 {strides = array<i32>} : memref<64x288xbf16, #tpu.memory_space<vmem>>, vector<64x32xbf16>,
    %c2_43 = arith.constant 2 : index
    %c0_44 = arith.constant 0 : index
    %c0_45 = arith.constant 0 : index
    %48 = vector.load %arg13[%c2_43, %c0_44, %c0_45] : memref<10x10x32xbf16, #tpu.memory_space<vmem>>, vector<8x8x32xbf16>
    %49 = vector.shape_cast %48 : vector<8x8x32xbf16> to vector<64x32xbf16>
    %c0_46 = arith.constant 0 : index
    %c192 = arith.constant 192 : index
    %50 = vector.load %arg14[%c0_46, %c192] : memref<64x288xbf16, #tpu.memory_space<vmem>>, vector<64x32xbf16>
    tpu.vector_store %arg14[%c0_46, %c192], %49 {strides = array<i32>} : memref<64x288xbf16, #tpu.memory_space<vmem>>, vector<64x32xbf16>,
    %c2_47 = arith.constant 2 : index
    %c1_48 = arith.constant 1 : index
    %c0_49 = arith.constant 0 : index
    %51 = vector.load %arg13[%c2_47, %c1_48, %c0_49] : memref<10x10x32xbf16, #tpu.memory_space<vmem>>, vector<8x8x32xbf16>
    %52 = vector.shape_cast %51 : vector<8x8x32xbf16> to vector<64x32xbf16>
    %c0_50 = arith.constant 0 : index
    %c224 = arith.constant 224 : index
    %53 = vector.load %arg14[%c0_50, %c224] : memref<64x288xbf16, #tpu.memory_space<vmem>>, vector<64x32xbf16>
    tpu.vector_store %arg14[%c0_50, %c224], %52 {strides = array<i32>} : memref<64x288xbf16, #tpu.memory_space<vmem>>, vector<64x32xbf16>,
    %c2_51 = arith.constant 2 : index
    %c2_52 = arith.constant 2 : index
    %c0_53 = arith.constant 0 : index
    %54 = vector.load %arg13[%c2_51, %c2_52, %c0_53] : memref<10x10x32xbf16, #tpu.memory_space<vmem>>, vector<8x8x32xbf16>
    %55 = vector.shape_cast %54 : vector<8x8x32xbf16> to vector<64x32xbf16>
    %c0_54 = arith.constant 0 : index
    %c256 = arith.constant 256 : index
    %56 = vector.load %arg14[%c0_54, %c256] : memref<64x288xbf16, #tpu.memory_space<vmem>>, vector<64x32xbf16>
    tpu.vector_store %arg14[%c0_54, %c256], %55 {strides = array<i32>} : memref<64x288xbf16, #tpu.memory_space<vmem>>, vector<64x32xbf16>,
    %c0_55 = arith.constant 0 : index
    %c0_56 = arith.constant 0 : index
    %57 = vector.load %arg14[%c0_55, %c0_56] : memref<64x288xbf16, #tpu.memory_space<vmem>>, vector<64x288xbf16>
    %58 = arith.index_cast %arg1 : i32 to index
    %c0_57 = arith.constant 0 : index
    %c0_58 = arith.constant 0 : index
    %59 = vector.load %arg6[%58, %c0_57, %c0_58] : memref<1x288x32xbf16, #tpu.memory_space<vmem>>, vector<1x288x32xbf16>
    %60 = vector.shape_cast %59 : vector<1x288x32xbf16> to vector<288x32xbf16>
    %cst_59 = arith.constant dense<0.000000e+00> : vector<64x32xf32>
    %61 = tpu.matmul %57, %60, %cst_59 {dimension_numbers = #tpu.dot_dimension_numbers<[1], [0], [0], [1], [0, 0, 1, 1], [], []>} : vector<64x288xbf16>, vector<288x32xbf16>, vector<64x32xf32> -> vector<64x32xf32>
    %62 = arith.index_cast %arg1 : i32 to index
    %c0_60 = arith.constant 0 : index
    %c0_61 = arith.constant 0 : index
    %63 = vector.load %arg7[%62, %c0_60, %c0_61] : memref<1x1x32xf32, #tpu.memory_space<vmem>>, vector<1x1x32xf32>
    %64 = vector.shape_cast %63 : vector<1x1x32xf32> to vector<1x32xf32>
    %65 = vector.broadcast %64 : vector<1x32xf32> to vector<64x32xf32>
    %66 = arith.mulf %61, %65 : vector<64x32xf32>
    %67 = arith.index_cast %arg1 : i32 to index
    %c0_62 = arith.constant 0 : index
    %c0_63 = arith.constant 0 : index
    %68 = vector.load %arg8[%67, %c0_62, %c0_63] : memref<1x1x32xf32, #tpu.memory_space<vmem>>, vector<1x1x32xf32>
    %69 = vector.shape_cast %68 : vector<1x1x32xf32> to vector<1x32xf32>
    %70 = vector.broadcast %69 : vector<1x32xf32> to vector<64x32xf32>
    %71 = arith.addf %66, %70 : vector<64x32xf32>
    %cst_64 = arith.constant 0.000000e+00 : f32
    %72 = vector.broadcast %cst_64 : f32 to vector<64x32xf32>
    %73 = arith.maximumf %71, %72 : vector<64x32xf32>
    %c0_65 = arith.constant 0 : index
    %c0_66 = arith.constant 0 : index
    %74 = vector.load %arg15[%c0_65, %c0_66] : memref<64x32xf32, #tpu.memory_space<vmem>>, vector<64x32xf32>
    %75 = arith.truncf %73 : vector<64x32xf32> to vector<64x32xbf16>
    %76 = arith.index_cast %arg1 : i32 to index
    %c0_67 = arith.constant 0 : index
    %c0_68 = arith.constant 0 : index
    %77 = vector.load %arg9[%76, %c0_67, %c0_68] : memref<1x32x32xbf16, #tpu.memory_space<vmem>>, vector<1x32x32xbf16>
    %78 = vector.shape_cast %77 : vector<1x32x32xbf16> to vector<32x32xbf16>
    %cst_69 = arith.constant dense<0.000000e+00> : vector<64x32xf32>
    %79 = tpu.matmul %75, %78, %cst_69 {dimension_numbers = #tpu.dot_dimension_numbers<[1], [0], [0], [1], [0, 0, 1, 1], [], []>} : vector<64x32xbf16>, vector<32x32xbf16>, vector<64x32xf32> -> vector<64x32xf32>
    %80 = arith.addf %74, %79 : vector<64x32xf32>
    %c0_70 = arith.constant 0 : index
    %c0_71 = arith.constant 0 : index
    %81 = vector.load %arg15[%c0_70, %c0_71] : memref<64x32xf32, #tpu.memory_space<vmem>>, vector<64x32xf32>
    tpu.vector_store %arg15[%c0_70, %c0_71], %80 {strides = array<i32>} : memref<64x32xf32, #tpu.memory_space<vmem>>, vector<64x32xf32>,
    %c0_i32_72 = arith.constant 0 : i32
    %82 = arith.cmpi eq, %arg1, %c0_i32_72 : i32
    %83 = arith.extui %82 : i1 to i32
    %c0_i32_73 = arith.constant 0 : i32
    %84 = arith.cmpi ne, %83, %c0_i32_73 : i32
    scf.if %84 {
      %c0_74 = arith.constant 0 : index
      %c0_75 = arith.constant 0 : index
      %85 = vector.load %arg15[%c0_74, %c0_75] : memref<64x32xf32, #tpu.memory_space<vmem>>, vector<64x32xf32>
      %c0_76 = arith.constant 0 : index
      %c0_77 = arith.constant 0 : index
      %86 = vector.load %arg10[%c0_76, %c0_77] : memref<1x32xf32, #tpu.memory_space<vmem>>, vector<1x32xf32>
      %87 = vector.broadcast %86 : vector<1x32xf32> to vector<64x32xf32>
      %88 = arith.mulf %85, %87 : vector<64x32xf32>
      %c0_78 = arith.constant 0 : index
      %c0_79 = arith.constant 0 : index
      %89 = vector.load %arg11[%c0_78, %c0_79] : memref<1x32xf32, #tpu.memory_space<vmem>>, vector<1x32xf32>
      %90 = vector.broadcast %89 : vector<1x32xf32> to vector<64x32xf32>
      %91 = arith.addf %88, %90 : vector<64x32xf32>
      %c0_80 = arith.constant 0 : index
      %c0_81 = arith.constant 0 : index
      %c0_82 = arith.constant 0 : index
      %92 = vector.load %arg2[%c0_80, %c0_81, %c0_82] : memref<1x64x32xf32, #tpu.memory_space<vmem>>, vector<1x64x32xf32>
      %93 = vector.shape_cast %92 : vector<1x64x32xf32> to vector<64x32xf32>
      %94 = arith.addf %91, %93 : vector<64x32xf32>
      %cst_83 = arith.constant 0.000000e+00 : f32
      %95 = vector.broadcast %cst_83 : f32 to vector<64x32xf32>
      %96 = arith.maximumf %94, %95 : vector<64x32xf32>
      %c0_84 = arith.constant 0 : index
      %c0_85 = arith.constant 0 : index
      %c0_86 = arith.constant 0 : index
      %97 = vector.load %arg12[%c0_84, %c0_85, %c0_86] : memref<1x64x32xf32, #tpu.memory_space<vmem>>, vector<1x64x32xf32>
      %98 = vector.shape_cast %97 : vector<1x64x32xf32> to vector<64x32xf32>
      %99 = vector.shape_cast %96 : vector<64x32xf32> to vector<1x64x32xf32>
      tpu.vector_store %arg12[%c0_84, %c0_85, %c0_86], %99 {strides = array<i32>} : memref<1x64x32xf32, #tpu.memory_space<vmem>>, vector<1x64x32xf32>,
    } else {
    }
    return
  }
  func.func @transform_0(%arg0: i32, %arg1: i32) -> (i32, i32, i32) {
    %c0_i32 = arith.constant 0 : i32
    %c0_i32_0 = arith.constant 0 : i32
    %c0_i32_1 = arith.constant 0 : i32
    return %arg0, %c0_i32, %c0_i32_0 : i32, i32, i32
  }
  func.func @transform_1(%arg0: i32, %arg1: i32) -> (i32, i32, i32) {
    %c0_i32 = arith.constant 0 : i32
    %c0_i32_0 = arith.constant 0 : i32
    %c0_i32_1 = arith.constant 0 : i32
    %c0_i32_2 = arith.constant 0 : i32
    return %c0_i32, %c0_i32_0, %c0_i32_1 : i32, i32, i32
  }
  func.func @transform_2(%arg0: i32, %arg1: i32) -> (i32, i32, i32) {
    %c0_i32 = arith.constant 0 : i32
    %c0_i32_0 = arith.constant 0 : i32
    %c0_i32_1 = arith.constant 0 : i32
    %c0_i32_2 = arith.constant 0 : i32
    return %c0_i32, %c0_i32_0, %c0_i32_1 : i32, i32, i32
  }
  func.func @transform_3(%arg0: i32, %arg1: i32) -> (i32, i32, i32) {
    %c0_i32 = arith.constant 0 : i32
    %c0_i32_0 = arith.constant 0 : i32
    %c0_i32_1 = arith.constant 0 : i32
    %c0_i32_2 = arith.constant 0 : i32
    return %c0_i32, %c0_i32_0, %c0_i32_1 : i32, i32, i32
  }
  func.func @transform_4(%arg0: i32, %arg1: i32) -> (i32, i32, i32) {
    %c0_i32 = arith.constant 0 : i32
    %c0_i32_0 = arith.constant 0 : i32
    %c0_i32_1 = arith.constant 0 : i32
    %c0_i32_2 = arith.constant 0 : i32
    return %c0_i32, %c0_i32_0, %c0_i32_1 : i32, i32, i32
  }
  func.func @transform_5(%arg0: i32, %arg1: i32) -> (i32, i32, i32) {
    %c0_i32 = arith.constant 0 : i32
    %c0_i32_0 = arith.constant 0 : i32
    %c0_i32_1 = arith.constant 0 : i32
    %c0_i32_2 = arith.constant 0 : i32
    return %c0_i32, %c0_i32_0, %c0_i32_1 : i32, i32, i32
  }
  func.func @transform_6(%arg0: i32, %arg1: i32) -> (i32, i32, i32) {
    %c0_i32 = arith.constant 0 : i32
    %c0_i32_0 = arith.constant 0 : i32
    %c0_i32_1 = arith.constant 0 : i32
    %c0_i32_2 = arith.constant 0 : i32
    return %c0_i32, %c0_i32_0, %c0_i32_1 : i32, i32, i32
  }
  func.func @transform_7(%arg0: i32, %arg1: i32) -> (i32, i32, i32) {
    %c0_i32 = arith.constant 0 : i32
    %c0_i32_0 = arith.constant 0 : i32
    %c0_i32_1 = arith.constant 0 : i32
    %c0_i32_2 = arith.constant 0 : i32
    return %c0_i32, %c0_i32_0, %c0_i32_1 : i32, i32, i32
  }
  func.func @transform_8(%arg0: i32, %arg1: i32) -> (i32, i32) {
    %c0_i32 = arith.constant 0 : i32
    %c0_i32_0 = arith.constant 0 : i32
    %c0_i32_1 = arith.constant 0 : i32
    return %c0_i32, %c0_i32_0 : i32, i32
  }
  func.func @transform_9(%arg0: i32, %arg1: i32) -> (i32, i32) {
    %c0_i32 = arith.constant 0 : i32
    %c0_i32_0 = arith.constant 0 : i32
    %c0_i32_1 = arith.constant 0 : i32
    return %c0_i32, %c0_i32_0 : i32, i32
  }
  func.func @transform_10(%arg0: i32, %arg1: i32) -> (i32, i32, i32) {
    %c0_i32 = arith.constant 0 : i32
    %c0_i32_0 = arith.constant 0 : i32
    %c0_i32_1 = arith.constant 0 : i32
    return %arg0, %c0_i32, %c0_i32_0 : i32, i32, i32
  }
}

</mosaic_0001>

<bundles_post_ra>
// kernel: _lambda_.1
= control target key start
LH: loop header
LB: loop body
LE: loop exit
PB: predicated region body
PF: predicated region fallthrough
CT: control target
= control target key end

     0   :  { %15 = vsyncpa [#allocation6], 0  ;;  %s3196_s0 = inlined_call_operand.vmem [shape: f32[2,64,32], index: 0, kind: input, shape index: {}]   ;;  %s3197_s1 = inlined_call_operand.vmem [shape: bf16[1,32,32], index: 1, kind: input, shape index: {}]   ;;  %s3198_s2 = inlined_call_operand.vmem [shape: f32[1,1,32], index: 2, kind: input, shape index: {}]   ;;  %s3199_s3 = inlined_call_operand.vmem [shape: f32[1,1,32], index: 3, kind: input, shape index: {}]   ;;  %s3200_s4 = inlined_call_operand.vmem [shape: bf16[1,288,32], index: 4, kind: input, shape index: {}]   ;;  %s3201_s5 = inlined_call_operand.vmem [shape: f32[1,1,32], index: 5, kind: input, shape index: {}]   ;;  %s3202_s6 = inlined_call_operand.vmem [shape: f32[1,1,32], index: 6, kind: input, shape index: {}]   ;;  %s3203_s7 = inlined_call_operand.vmem [shape: bf16[1,32,32], index: 7, kind: input, shape index: {}]   ;;  %s3204_s8 = inlined_call_operand.vmem [shape: f32[1,32], index: 8, kind: input, shape index: {}]   ;;  %s3205_s9 = inlined_call_operand.vmem [shape: f32[1,32], index: 9, kind: input, shape index: {}]   ;;  %s3206_s10 = inlined_call_operand.hbm [shape: f32[2,64,32], index: 10, kind: output, shape index: {}]  }
   0x1   :  { %17 = vsyncpa [#allocation6 + $0x1], 0  ;;  %s2635_s13 = smov 0   ;;  %s2637_s14 = smov 0  }
   0x2   :  { %s2639_s15 = smov 0   ;;  %s2641_s16 = smov 0  }
   0x3   :  { %s2643_s17 = smov 0   ;;  %s2645_s18 = smov 0  }
   0x4 LB: > { %s2155_s19 = sadd.s32 4294967295, %s2570_s18   ;;  %s2156_s20 = sadd.s32 4294967294, %s2570_s18   ;;  %s2570_s18 = sphi %s2645_s18, %s23_s18   ;;  %s2566_s17 = sphi %s2643_s17, %s3217_s17   ;;  %s2562_s16 = sphi %s2641_s16, %s3216_s16   ;;  %s2558_s15 = sphi %s2639_s15, %s3215_s15   ;;  %s2554_s14 = sphi %s2637_s14, %s3214_s14   ;;  %s2550_s13 = sphi %s2635_s13, %s3213_s13  }
   0x5   : > { %s35_s21 = sadd.s32 1, %s2566_s17  ;;  %s257_s22 = sadd.s32 1, %s2558_s15 }
   0x6   : > { %p37_p0 = scmp.ge.s32.totalorder %s35_s21, 2  ;;  %p267_p1 = scmp.ne.s32.totalorder %s2558_s15, %s2554_s14 }
   0x7   : > { %p268_p2 = scmp.eq.s32.totalorder %s2155_s19, 1  ;;  %p273_p3 = scmp.ne.s32.totalorder %s2554_s14, %s2550_s13 }
   0x8   : > { %s3219_s21 = smov (%p37_p0, %s35_s21), 0  ;;  %p274_p5 = scmp.eq.s32.totalorder %s2156_s20, 1 }
   0x9   : > { %p2675_p4 = por %p268_p2, %p267_p1  ;;  %s254_s24 = ssub.s32 %s2566_s17, %s3219_s21 }
   0xa   : > { %p2159_p6 = scmp.ge.s32.totalorder %s2570_s18, 1  ;;  %p255_p7 = scmp.eq.s32.totalorder %s254_s24, 0 }
   0xb   : > { %p2682_p8 = por %p274_p5, %p273_p3  ;;  %p327_p9 = scmp.lt.s32.totalorder %s2570_s18, 3 }
   0xc   : > { %s2688_s26 = scalar_select %p255_p7, %s2558_s15, %s257_s22  }
   0xd   : > { %p328_p10 = pnand %p2159_p6, %p327_p9 }
   0xe   : > { %v2458_v0 = vld [vmem:[%s3197_s1] sm:$0xff] (!%p328_p10)   ;;  %p365_p11 = scmp.lt.s32.totalorder (!%p328_p10), %s2562_s16, 1  ;;  %v2459_v1 = vld [vmem:[%s3197_s1 + $0x8] sm:$0xff] (!%p328_p10)   ;;  %vm375_vm0 = vcmask (!%p328_p10), 261120   ;;  %vm639_vm1 = vcmask (!%p328_p10), 257024   ;;  %vm641_vm2 = vcmask (!%p328_p10), 253952  }
   0xf   : > { %331 = sbr.rel (%p328_p10) target bundleno = 931 (0x3a3), region = 60  ;;  %2360 = vmatprep.subr.bf16.mxu0 (!%p328_p10), %v2458_v0  ;;  %v2572_v14 = vmov (!%p328_p10), 0   ;;  %v2463_v15 = vld [vmem:[%s3200_s4 + $0x80] sm:$0xff] (!%p328_p10)   ;;  %v2465_v16 = vld [vmem:[%s3200_s4 + $0x88] sm:$0xff] (!%p328_p10)   ;;  %vm557_vm3 = vcmask (!%p328_p10), 1040384   ;;  %vm890_vm4 = vcmask (!%p328_p10), 1042432  }
  0x10   : > { %2361 = vmatpush3.bf16.msra.mxu0 (!%p328_p10), %v2458_v0  ;;  %657 = vst.msk [vmem:[#allocation2] sm:$0xf] (!%p328_p10), %vm639_vm1, %v2572_v14  ;;  %660 = vst.msk [vmem:[#allocation2 + $0x48] sm:$0xf] (!%p328_p10), %vm639_vm1, %v2572_v14  ;;  %v2728_v20 = vld [vmem:[%s3198_s2] ss:$0 sm:$0xff] (!%p328_p10) }
  0x11   : > { %2362 = vmatprep.subr.bf16.mxu0 (!%p328_p10), %v2459_v1  ;;  %658 = vst.msk [vmem:[#allocation2 + $0x4] sm:$0x1] (!%p328_p10), %vm641_vm2, %v2572_v14  ;;  %661 = vst.msk [vmem:[#allocation2 + $0x4c] sm:$0x1] (!%p328_p10), %vm641_vm2, %v2572_v14  ;;  %v2733_v22 = vld [vmem:[%s3199_s3] ss:$0 sm:$0xff] (!%p328_p10) }
  0x12   : > { %v2470_v62 = vld [vmem:[%s3200_s4 + $0x40] sm:$0xff] (!%p328_p10)   ;;  %vm891_vm5 = vcmask (!%p328_p10), 1046532   ;;  %s2573_s19 = smov (!%p328_p10), 96   ;;  %s2574_s20 = smov (!%p328_p10), 64   ;;  %vm714_vm7 = vsmask.f32 (!%p328_p10), 3328 }
  0x13   : > { %v2471_v63 = vld [vmem:[%s3200_s4] sm:$0xff] (!%p328_p10)   ;;  %2308 = vmatprep.subr.bf16.mxu1 (!%p328_p10), %v2470_v62  ;;  %vm2820_vm6 = vmor (!%p328_p10), %vm890_vm4, %vm891_vm5  ;;  %vm715_vm8 = vsmask.f32 (!%p328_p10), 7440  ;;  %s2575_s24 = smov (!%p328_p10), 32   ;;  %vm853_vm10 = vcmask (!%p328_p10), 523520   ;;  %vm949_vm11 = vcmask (!%p328_p10), 785920  }
  0x14   : > { %2363 = vmatpush3.bf16.msra.mxu0 (!%p328_p10), %v2459_v1  ;;  %2309 = vmatpush3.bf16.msra.mxu1 (!%p328_p10), %v2471_v63  ;;  %vm2889_vm9 = vmor (!%p328_p10), %vm714_vm7, %vm715_vm8  ;;  %vm994_vm12 = vcmask (!%p328_p10), 1048320   ;;  %s362_s27 = sand.u32 (!%p328_p10), 1, %s2554_s14   ;;  %s2301_s30 = sshll.u32 (!%p328_p10), %s2562_s16, 10 }
  0x15   : > { %2372 = vmatprep.subr.bf16.mxu0 (!%p328_p10), %v2463_v15  ;;  %s2160_s28 = sshll.u32 (!%p328_p10), %s362_s27, 6 }
  0x16   : > { %s366_s11 = scalar_select %p365_p11, %s2562_s16, 1 }
  0x17   : > { %v698_v17 = vld [vmem:[#allocation2] sm:$0xf]  ;;  %v1298_v56 = vld [vmem:[#allocation2 + $0x48] sm:$0xf]  ;;  %s3109_s29 = scalar_lea.vmem [#allocation5], %s2160_s28  ;;  %s3150_s16 = scalar_lea.sflag [#allocation6], %s362_s27 }
  0x18   : > { %s2284_s12 = sshll.u32 %s366_s11, 6  ;;  %v718_v18 = vshrl.u32 %v698_v17, 16  ;;  %v721_v19 = vshll.u32 %v698_v17, 16  ;;  %v2741_v34 = vld [vmem:[#allocation2] sm:$0xe]  ;;  %s2075_s11 = sshll.u32 %s3109_s29, 4  ;;  %s3140_s11 = int_to_ptr.vmem [resolvable:$true] %s2075_s11 }
  0x19   : > { %s2701_s22 = scalar_lea.vmem %s3196_s0, %s2284_s12  ;;  %v2743_v35 = vld [vmem:[#allocation2 + $0x4] sm:$0x1]  ;;  %v2195_v44 = vrot.slane %v2741_v34, 9  ;;  %v2778_v17 = vld [vmem:[#allocation2 + $0x4c] sm:$0x1] }
  0x1a   : > { %v384_v2 = vld [vmem:[%s2701_s22] sm:$0xff]  ;;  %v385_v3 = vld [vmem:[%s2701_s22 + $0x8] sm:$0xff]  ;;  %v386_v4 = vld [vmem:[%s2701_s22 + $0x10] sm:$0xff]  ;;  %v720_v23 = vrot.slane %v718_v18, 4  ;;  %v723_v24 = vrot.slane %v721_v19, 5  ;;  %v895_v45 = vrot.slane %v2743_v35, 5 }
  0x1b   : > { %v392_v5 = vpack.c.bf16 %v385_v3, %v384_v2  ;;  %v387_v6 = vld [vmem:[%s2701_s22 + $0x18] sm:$0xff]  ;;  %v388_v7 = vld [vmem:[%s2701_s22 + $0x20] sm:$0xff]  ;;  %v389_v8 = vld [vmem:[%s2701_s22 + $0x28] sm:$0xff]  ;;  %v1402_v18 = vshll.u32 %v1298_v56, 16 }
  0x1c   : > { %v393_v9 = vpack.c.bf16 %v387_v6, %v386_v4  ;;  %v394_v10 = vpack.c.bf16 %v389_v8, %v388_v7  ;;  %v390_v11 = vld [vmem:[%s2701_s22 + $0x30] sm:$0xff]  ;;  %v391_v12 = vld [vmem:[%s2701_s22 + $0x38] sm:$0xff]  ;;  %v724_v36 = vor.u32 %v723_v24, %v720_v23  ;;  %v699_v39 = vld [vmem:[#allocation2 + $0x4] sm:$0x1] }
  0x1d   : > { %2364 = vmatprep.mubr.msk.bf16.mxu0 %vm375_vm0, %v392_v5  ;;  %v395_v13 = vpack.c.bf16 %v391_v12, %v390_v11  ;;  %v727_v50 = vshll.u32 %v699_v39, 16  ;;  %v2772_v12 = vld [vmem:[#allocation2 + $0x48] sm:$0xe] }
  0x1e   : > { %2365 = vmatmul.mubr.msk.bf16.vlgmr.msra.gmra.mrb[0].mxu0 %vm375_vm0, %v393_v9  ;;  %v2749_v49 = vrot.slane %v724_v36, 4  ;;  %v2473_v39 = vld [vmem:[%s3200_s4 + $0x8] sm:$0xff]  }
  0x1f   : > { %2368 = vmatprep.mubr.msk.bf16.mxu0 %vm375_vm0, %v394_v10  ;;  %2373 = vmatpush3.bf16.msra.mxu0 %v2463_v15 }
  0x20   : > { %2374 = vmatprep.subr.bf16.mxu0 %v2465_v16 }
  0x23   : > { %2375 = vmatpush3.bf16.msra.mxu0 %v2465_v16 }
  0x26   : > { %2369 = vmatmul.mubr.msk.bf16.gmra.mrb[4].mxu0 %vm375_vm0, %v395_v13  ;;  %v1399_v13 = vshrl.u32 %v1298_v56, 16 }
  0xf1   : > { %v2366_v21 = vpop.f32.mrb[0].mxu0 }
  0xf2   : > { %v503_v25 = vmul.f32 %v2366_v21, %v2728_v20  ;;  %v462_v26 = vpop.f32.mrb[1].mxu0 }
  0xf3   : > { %v501_v27 = vmul.f32 %v2728_v20, %v462_v26  ;;  %v2367_v28 = vpop.f32.mrb[2].mxu0  ;;  %v2783_v26 = vrot.slane %v727_v50, 5 }
  0xf4   : > { %v519_v29 = vadd.f32 %v2733_v22, %v503_v25  ;;  %v504_v30 = vmul.f32 %v2367_v28, %v2728_v20  ;;  %v465_v31 = vpop.f32.mrb[3].mxu0 }
  0xf5   : > { %v517_v32 = vadd.f32 %v2733_v22, %v501_v27  ;;  %v502_v33 = vmul.f32 %v2728_v20, %v465_v31  ;;  %v2242_v27 = vrot.slane %v2772_v12, 9  ;;  %v2789_v31 = vld [vmem:[#allocation2 + $0x4c] sm:$0x1] }
  0xf6   : > { %v527_v37 = vmax.f32 %v519_v29, 0.0  ;;  %v520_v38 = vadd.f32 %v2733_v22, %v504_v30  ;;  %v1502_v30 = vrot.slane %v2778_v17, 5 }
  0xf7   : > { %v525_v40 = vmax.f32 %v517_v32, 0.0  ;;  %v518_v41 = vadd.f32 %v2733_v22, %v502_v33  ;;  %v2791_v32 = vrot.slane %v1399_v13, 4 }
  0xf8   : > { %v543_v42 = vrot.slane %v527_v37, 7  ;;  %v528_v43 = vmax.f32 %v520_v38, 0.0  ;;  %v2795_v37 = vrot.slane %v1402_v18, 5  ;;  %v2472_v38 = vld [vmem:[%s3200_s4 + $0x48] sm:$0xff]  }
  0xf9   : > { %v541_v46 = vrot.slane %v525_v40, 7  ;;  %v526_v47 = vmax.f32 %v518_v41, 0.0  ;;  %v2370_v48 = vpop.f32.mrb[4].mxu0  ;;  %2310 = vmatprep.subr.bf16.mxu1 %v2472_v38 }
  0xfa   : > { %v560_v51 = vsel %vm557_vm3, 0.0, %v543_v42  ;;  %v568_v52 = vsel %vm557_vm3, %v543_v42, 0.0  ;;  %v544_v53 = vrot.slane %v528_v43, 7  ;;  %v507_v54 = vmul.f32 %v2370_v48, %v2728_v20  ;;  %v478_v55 = vpop.f32.mrb[5].mxu0  ;;  %2311 = vmatpush3.bf16.msra.mxu1 %v2473_v39 }
  0xfb   : > { %v2289_v57 = vpack.c.bf16 %v560_v51, %v560_v51  ;;  %v2290_v58 = vpack.c.bf16 %v568_v52, %v568_v52  ;;  %v558_v59 = vsel %vm557_vm3, 0.0, %v541_v46  ;;  %v566_v60 = vsel %vm557_vm3, %v541_v46, 0.0  ;;  %v2371_v61 = vpop.f32.mrb[6].mxu0 }
  0xfc   : > { %v2285_v0 = vpack.c.bf16 %v558_v59, %v558_v59  ;;  %v2286_v1 = vpack.c.bf16 %v566_v60, %v566_v60  ;;  %v561_v2 = vsel %vm557_vm3, 0.0, %v544_v53  ;;  %v569_v3 = vsel %vm557_vm3, %v544_v53, 0.0  ;;  %v481_v4 = vpop.f32.mrb[7].mxu0 }
  0xfd   : > { %645 = vst.msk [vmem:[#allocation2 + $0x18] sm:$0xf] %vm639_vm1, %v2289_v57  ;;  %v2291_v5 = vpack.c.bf16 %v561_v2, %v561_v2  ;;  %v2292_v6 = vpack.c.bf16 %v569_v3, %v569_v3  ;;  %v542_v7 = vrot.slane %v526_v47, 7  ;;  %v523_v8 = vadd.f32 %v2733_v22, %v507_v54 }
  0xfe   : > { %646 = vst.msk [vmem:[#allocation2 + $0x1c] sm:$0x1] %vm641_vm2, %v2290_v58  ;;  %642 = vst.msk [vmem:[#allocation2 + $0xc] sm:$0x1] %vm641_vm2, %v2286_v1  ;;  %v505_v9 = vmul.f32 %v2728_v20, %v478_v55  ;;  %v508_v10 = vmul.f32 %v2371_v61, %v2728_v20  ;;  %v506_v11 = vmul.f32 %v2728_v20, %v481_v4  ;;  %v1408_v52 = vshll.u32 %v2789_v31, 16 }
  0xff   : > { %640 = vst.msk [vmem:[#allocation2 + $0x8] sm:$0xf] %vm639_vm1, %v2285_v0  ;;  %647 = vst.msk [vmem:[#allocation2 + $0x20] sm:$0xf] %vm639_vm1, %v2291_v5  ;;  %v559_v14 = vsel %vm557_vm3, 0.0, %v542_v7  ;;  %v567_v15 = vsel %vm557_vm3, %v542_v7, 0.0  ;;  %v1405_v17 = vor.u32 %v2795_v37, %v2791_v32 }
 0x100   : > { %648 = vst.msk [vmem:[#allocation2 + $0x24] sm:$0x1] %vm641_vm2, %v2292_v6  ;;  %v531_v16 = vmax.f32 %v523_v8, 0.0  ;;  %v2287_v19 = vpack.c.bf16 %v559_v14, %v559_v14  ;;  %v2288_v21 = vpack.c.bf16 %v567_v15, %v567_v15  ;;  %v521_v20 = vadd.f32 %v2733_v22, %v505_v9 }
 0x101   : > { %v524_v23 = vadd.f32 %v2733_v22, %v508_v10  ;;  %v522_v25 = vadd.f32 %v2733_v22, %v506_v11 }
 0x102   : > { %v547_v24 = vrot.slane %v531_v16, 7  ;;  %643 = vst.msk [vmem:[#allocation2 + $0x10] sm:$0xf] %vm639_vm1, %v2287_v19  ;;  %v529_v28 = vmax.f32 %v521_v20, 0.0 }
 0x103   : > { %644 = vst.msk [vmem:[#allocation2 + $0x14] sm:$0x1] %vm641_vm2, %v2288_v21  ;;  %v532_v29 = vmax.f32 %v524_v23, 0.0  ;;  %v530_v36 = vmax.f32 %v522_v25, 0.0 }
 0x104   : > { %v564_v33 = vsel %vm557_vm3, 0.0, %v547_v24  ;;  %v572_v22 = vsel %vm557_vm3, %v547_v24, 0.0  ;;  %v1442_v40 = vld [vmem:[#allocation2 + $0x18] sm:$0xe]  ;;  %v545_v46 = vrot.slane %v529_v28, 7 }
 0x105   : > { %v1443_v41 = vld [vmem:[#allocation2 + $0x1c] sm:$0x1]  ;;  %v2297_v42 = vpack.c.bf16 %v564_v33, %v564_v33  ;;  %v2298_v43 = vpack.c.bf16 %v572_v22, %v572_v22  ;;  %v548_v47 = vrot.slane %v532_v29, 7  ;;  %v2236_v48 = vrot.slane %v1442_v40, 9  ;;  %v1151_v3 = vld [vmem:[#allocation2 + $0x18] sm:$0xe] }
 0x106   : > { %v1478_v50 = vrot.slane %v1443_v41, 5  ;;  %v546_v51 = vrot.slane %v530_v36, 7  ;;  %v2804_v53 = vld [vmem:[#allocation2 + $0x20] sm:$0xe]  ;;  %v562_v55 = vsel %vm557_vm3, 0.0, %v545_v46  ;;  %v570_v56 = vsel %vm557_vm3, %v545_v46, 0.0 }
 0x107   : > { %v2806_v54 = vld [vmem:[#allocation2 + $0x24] sm:$0x1]  ;;  %653 = vst.msk [vmem:[#allocation2 + $0x38] sm:$0xf] %vm639_vm1, %v2297_v42  ;;  %v2237_v57 = vrot.slane %v2804_v53, 9  ;;  %v2293_v59 = vpack.c.bf16 %v562_v55, %v562_v55  ;;  %v2294_v60 = vpack.c.bf16 %v570_v56, %v570_v56  ;;  %v565_v62 = vsel %vm557_vm3, 0.0, %v548_v47 }
 0x108   : > { %654 = vst.msk [vmem:[#allocation2 + $0x3c] sm:$0x1] %vm641_vm2, %v2298_v43  ;;  %v1482_v58 = vrot.slane %v2806_v54, 5  ;;  %v2460_v61 = vld [vmem:[#allocation2 + $0x18] ss:$8 sps:$4 sm:$0xff]   ;;  %v573_v63 = vsel %vm557_vm3, %v548_v47, 0.0  ;;  %v2299_v6 = vpack.c.bf16 %v565_v62, %v565_v62  ;;  %v1479_v25 = vsel %vm2820_vm6, %v2236_v48, %v1478_v50 }
 0x109   : > { %v563_v0 = vsel %vm557_vm3, 0.0, %v546_v51  ;;  %v571_v1 = vsel %vm557_vm3, %v546_v51, 0.0  ;;  %v1440_v4 = vld [vmem:[#allocation2 + $0x10] sm:$0xe]  ;;  %649 = vst.msk [vmem:[#allocation2 + $0x28] sm:$0xf] %vm639_vm1, %v2293_v59  ;;  %v2300_v7 = vpack.c.bf16 %v573_v63, %v573_v63  ;;  %984 = vrot.lane.b32.xlu1 %v2460_v61, %s2573_s19 }
 0x10a   : > { %v1441_v5 = vld [vmem:[#allocation2 + $0x14] sm:$0x1]  ;;  %650 = vst.msk [vmem:[#allocation2 + $0x2c] sm:$0x1] %vm641_vm2, %v2294_v60  ;;  %v2295_v8 = vpack.c.bf16 %v563_v0, %v563_v0  ;;  %v2296_v9 = vpack.c.bf16 %v571_v1, %v571_v1  ;;  %v1152_v10 = vld [vmem:[#allocation2 + $0x1c] sm:$0x1] }
 0x10b   : > { %v2235_v11 = vrot.slane %v1440_v4, 9  ;;  %v1474_v13 = vrot.slane %v1441_v5, 5  ;;  %v1153_v14 = vld [vmem:[#allocation2 + $0x20] sm:$0xe]  ;;  %v1154_v15 = vld [vmem:[#allocation2 + $0x24] sm:$0x1]  ;;  %v1483_v4 = vsel %vm2820_vm6, %v2237_v57, %v1482_v58  ;;  %v1503_v58 = vsel %vm2820_vm6, %v2242_v27, %v1502_v30 }
 0x10c   : > { %655 = vst.msk [vmem:[#allocation2 + $0x40] sm:$0xf] %vm639_vm1, %v2299_v6  ;;  %651 = vst.msk [vmem:[#allocation2 + $0x30] sm:$0xf] %vm639_vm1, %v2295_v8  ;;  %v2217_v16 = vrot.slane %v1151_v3, 9  ;;  %v1189_v18 = vrot.slane %v1152_v10, 5 }
 0x10d   : > { %656 = vst.msk [vmem:[#allocation2 + $0x44] sm:$0x1] %vm641_vm2, %v2300_v7  ;;  %652 = vst.msk [vmem:[#allocation2 + $0x34] sm:$0x1] %vm641_vm2, %v2296_v9  ;;  %v2218_v19 = vrot.slane %v1153_v14, 9  ;;  %v1193_v21 = vrot.slane %v1154_v15, 5  ;;  %v1475_v24 = vsel %vm2820_vm6, %v2235_v11, %v1474_v13 }
 0x10e   : > { %v2461_v20 = vld [vmem:[#allocation2 + $0x10] ss:$8 sps:$4 sm:$0xff]   ;;  %v1147_v23 = vld [vmem:[#allocation2 + $0x8] sm:$0xe]  ;;  %v1190_v33 = vsel %vm2820_vm6, %v2217_v16, %v1189_v18  ;;  %v1148_v36 = vld [vmem:[#allocation2 + $0xc] sm:$0x1]  ;;  %v2243_v38 = vcombine.low %v1475_v24, %v1479_v25  ;;  %v896_v16 = vsel %vm2820_vm6, %v2195_v44, %v895_v45 }
 0x10f   : > { %v1450_v28 = vld [vmem:[#allocation2 + $0x38] sm:$0xe]  ;;  %v1451_v29 = vld [vmem:[#allocation2 + $0x3c] sm:$0x1]  ;;  %v1194_v22 = vsel %vm2820_vm6, %v2218_v19, %v1193_v21  ;;  %1268 = vrot.lane.b32.xlu1 %v2461_v20, %s2574_s20  ;;  %v1149_v42 = vld [vmem:[#allocation2 + $0x10] sm:$0xe] }
 0x110   : > { %v2240_v39 = vrot.slane %v1450_v28, 9  ;;  %v1494_v40 = vrot.slane %v1451_v29, 5  ;;  %v2224_v41 = vcombine.low %v1190_v33, %v1194_v22  ;;  %v1150_v43 = vld [vmem:[#allocation2 + $0x14] sm:$0x1]  ;;  %v2215_v46 = vrot.slane %v1147_v23, 9  ;;  %1520 = vst.msk [vmem:[#allocation3 + $0x10] sm:$0xff] %vm375_vm0, %v2243_v38 }
 0x111   : > { %v1181_v47 = vrot.slane %v1148_v36, 5  ;;  %v2216_v48 = vrot.slane %v1149_v42, 9  ;;  %v1185_v50 = vrot.slane %v1150_v43, 5  ;;  %v1446_v51 = vld [vmem:[#allocation2 + $0x28] sm:$0xe]  ;;  %v2474_v10 = vld [vmem:[%s3200_s4 + $0x50] sm:$0xff]  }
 0x112   : > { %v1447_v55 = vld [vmem:[#allocation2 + $0x2c] sm:$0x1]  ;;  %1225 = vrot.lane.b32.xlu0 %v2224_v41, %s2575_s24  ;;  %v2238_v56 = vrot.slane %v1446_v51, 9  ;;  %v2462_v62 = vld [vmem:[#allocation2 + $0x8] ss:$8 sps:$4 sm:$0xff]   ;;  %v1495_v57 = vsel %vm2820_vm6, %v2240_v39, %v1494_v40  ;;  %2312 = vmatprep.subr.bf16.mxu1 %v2474_v10  ;;  %v2476_v40 = vld [vmem:[%s3200_s4 + $0x58] sm:$0xff]   ;;  %v730_v51 = vsel %vm2889_vm9, %v2749_v49, %v2783_v26 }
 0x113   : > { %v1486_v59 = vrot.slane %v1447_v55, 5  ;;  %v1182_v60 = vsel %vm2820_vm6, %v2215_v46, %v1181_v47  ;;  %v1186_v61 = vsel %vm2820_vm6, %v2216_v48, %v1185_v50  ;;  %v1452_v63 = vld [vmem:[#allocation2 + $0x40] sm:$0xe]  ;;  %v1448_v1 = vld [vmem:[#allocation2 + $0x30] sm:$0xe]  ;;  %982 = vrot.lane.b32.xlu1 %v2462_v62, %s2573_s19  ;;  %v2898_v43 = vrot.slane %v1405_v17, 4 }
 0x114   : > { %v1453_v0 = vld [vmem:[#allocation2 + $0x44] sm:$0x1]  ;;  %v2223_v3 = vcombine.low %v1182_v60, %v1186_v61  ;;  %v2241_v5 = vrot.slane %v1452_v63, 9  ;;  %v1449_v7 = vld [vmem:[#allocation2 + $0x34] sm:$0x1]  ;;  %v2239_v8 = vrot.slane %v1448_v1, 9 }
 0x115   : > { %v1498_v6 = vrot.slane %v1453_v0, 5  ;;  %v1487_v9 = vsel %vm2820_vm6, %v2238_v56, %v1486_v59  ;;  %v1490_v11 = vrot.slane %v1449_v7, 5  ;;  %v2464_v53 = vld [vmem:[#allocation2 + $0x20] ss:$8 sps:$4 sm:$0xff]   ;;  %v2475_v13 = vld [vmem:[%s3200_s4 + $0x10] sm:$0xff]   ;;  %v2905_v50 = vrot.slane %v1408_v52, 5 }
 0x116   : > { %1223 = vrot.lane.b32.xlu0 %v2223_v3, %s2575_s24  ;;  %v2244_v54 = vcombine.low %v1483_v4, %v1487_v9  ;;  %v860_v14 = vld [vmem:[#allocation2 + $0x8] sm:$0xe]  ;;  %v861_v15 = vld [vmem:[#allocation2 + $0xc] sm:$0x1]  ;;  %2313 = vmatpush3.bf16.msra.mxu1 %v2475_v13  ;;  %v862_v45 = vld [vmem:[#allocation2 + $0x10] sm:$0xe] }
 0x117   : > { %v700_v18 = vld [vmem:[#allocation2 + $0x8] sm:$0xf]  ;;  %v1499_v12 = vsel %vm2820_vm6, %v2241_v5, %v1498_v6  ;;  %v1526_v27 = vld [vmem:[#allocation3 + $0x10] sm:$0xff]  ;;  %v2196_v30 = vrot.slane %v860_v14, 9  ;;  %v899_v19 = vrot.slane %v861_v15, 5  ;;  %v1491_v34 = vsel %vm2820_vm6, %v2239_v8, %v1490_v11  ;;  %2314 = vmatprep.subr.bf16.mxu1 %v2476_v40 }
 0x118   : > { %v701_v21 = vld [vmem:[#allocation2 + $0xc] sm:$0x1]  ;;  %v732_v20 = vshrl.u32 %v700_v18, 16  ;;  %1521 = vst.msk [vmem:[#allocation3 + $0x28] sm:$0xff] %vm375_vm0, %v2244_v54  ;;  %2376 = vmatprep.mubr.msk.bf16.mxu0 %vm375_vm0, %v1526_v27  ;;  %v735_v35 = vshll.u32 %v700_v18, 16  ;;  %v2245_v24 = vcombine.low %v1491_v34, %v1495_v57  ;;  %v2246_v32 = vcombine.low %v1499_v12, %v1503_v58  ;;  %v2477_v34 = vld [vmem:[%s3200_s4 + $0x18] sm:$0xff]  }
 0x119   : > { %v741_v44 = vshll.u32 %v701_v21, 16  ;;  %v863_v23 = vld [vmem:[#allocation2 + $0x14] sm:$0x1]  ;;  %v900_v37 = vsel %vm2820_vm6, %v2196_v30, %v899_v19  ;;  %v864_v28 = vld [vmem:[#allocation2 + $0x18] sm:$0xe]  ;;  %v2197_v33 = vrot.slane %v862_v45, 9 }
 0x11a   : > { %1270 = vrot.lane.b32.xlu0 %v2464_v53, %s2574_s20  ;;  %v734_v25 = vrot.slane %v732_v20, 4  ;;  %v865_v29 = vld [vmem:[#allocation2 + $0x1c] sm:$0x1]  ;;  %v2203_v22 = vcombine.low %v896_v16, %v900_v37  ;;  %v737_v38 = vrot.slane %v735_v35, 5  ;;  %v903_v39 = vrot.slane %v863_v23, 5  ;;  %1522 = vst.msk [vmem:[#allocation3 + $0x40] sm:$0xff] %vm375_vm0, %v2245_v24  ;;  %2315 = vmatpush3.bf16.msra.mxu1 %v2477_v34 }
 0x11b   : > { %1523 = vst.msk [vmem:[#allocation3 + $0x58] sm:$0xff] %vm375_vm0, %v2246_v32  ;;  %v2198_v41 = vrot.slane %v864_v28, 9  ;;  %v907_v42 = vrot.slane %v865_v29, 5  ;;  %v743_v47 = vrot.slane %v741_v44, 5  ;;  %v1284_v56 = vld [vmem:[#allocation2 + $0x10] sm:$0xf] }
 0x11c   : > { %937 = vrot.lane.b32.xlu1 %v2203_v22, %s2574_s20  ;;  %v738_v46 = vor.u32 %v737_v38, %v734_v25  ;;  %v904_v48 = vsel %vm2820_vm6, %v2197_v33, %v903_v39  ;;  %v1285_v59 = vld [vmem:[#allocation2 + $0x14] sm:$0x1]  ;;  %v1286_v60 = vld [vmem:[#allocation2 + $0x18] sm:$0xf]  ;;  %v1287_v0 = vld [vmem:[#allocation2 + $0x1c] sm:$0x1] }
 0x11d   : > { %v908_v55 = vsel %vm2820_vm6, %v2198_v41, %v907_v42  ;;  %v1301_v1 = vshrl.u32 %v1284_v56, 16  ;;  %v1304_v31 = vshll.u32 %v1284_v56, 16  ;;  %v1310_v52 = vshll.u32 %v1285_v59, 16  ;;  %v702_v6 = vld [vmem:[#allocation2 + $0x10] sm:$0xf]  ;;  %v2482_v34 = vld [vmem:[%s3200_s4 + $0x28] sm:$0xff]  }
 0x11e   : > { %v739_v61 = vrot.slane %v738_v46, 4  ;;  %v2204_v62 = vcombine.low %v904_v48, %v908_v55  ;;  %v1315_v3 = vshrl.u32 %v1286_v60, 16  ;;  %v1318_v4 = vshll.u32 %v1286_v60, 16  ;;  %v2467_v26 = vld [vmem:[#allocation2 + $0x28] ss:$8 sps:$4 sm:$0xff]  }
 0x11f   : > { %v1529_v63 = vld [vmem:[#allocation3 + $0x28] sm:$0xff]  ;;  %v1324_v5 = vshll.u32 %v1287_v0, 16  ;;  %v1303_v7 = vrot.slane %v1301_v1, 4  ;;  %v1306_v8 = vrot.slane %v1304_v31, 5  ;;  %v703_v9 = vld [vmem:[#allocation2 + $0x14] sm:$0x1] }
 0x120   : > { %2377 = vmatmul.mubr.msk.bf16.vlgmr.msra.gmra.mrb[8].mxu0 %vm375_vm0, %v1529_v63  ;;  %v744_v49 = vsel %vm2889_vm9, %v739_v61, %v743_v47  ;;  %939 = vrot.lane.b32.xlu1 %v2204_v62, %s2574_s20  ;;  %v704_v10 = vld [vmem:[#allocation2 + $0x18] sm:$0xf]  ;;  %v1312_v54 = vrot.slane %v1310_v52, 5  ;;  %v1317_v57 = vrot.slane %v1315_v3, 4  ;;  %v1320_v58 = vrot.slane %v1318_v4, 5  ;;  %v2479_v0 = vld [vmem:[%s3200_s4 + $0x60] sm:$0xff]  }
 0x121   : > { %v2191_v11 = vcombine.low %v730_v51, %v744_v49  ;;  %v1532_v53 = vld [vmem:[#allocation3 + $0x40] sm:$0xff]  ;;  %v705_v13 = vld [vmem:[#allocation2 + $0x1c] sm:$0x1]  ;;  %v1307_v14 = vor.u32 %v1306_v8, %v1303_v7  ;;  %v1326_v15 = vrot.slane %v1324_v5, 5  ;;  %v746_v16 = vshrl.u32 %v702_v6, 16  ;;  %v2480_v5 = vld [vmem:[%s3200_s4 + $0x20] sm:$0xff]   ;;  %2316 = vmatprep.subr.bf16.mxu1 %v2479_v0 }
 0x122   : > { %2380 = vmatprep.mubr.msk.bf16.mxu0 %vm375_vm0, %v1532_v53  ;;  %v749_v18 = vshll.u32 %v702_v6, 16  ;;  %v1155_v12 = vld [vmem:[#allocation2 + $0x28] sm:$0xe]  ;;  %v2466_v17 = vld [vmem:[#allocation2 + $0x30] ss:$8 sps:$4 sm:$0xff]   ;;  %v1321_v27 = vor.u32 %v1320_v58, %v1317_v57  ;;  %v755_v30 = vshll.u32 %v703_v9, 16  ;;  %2317 = vmatpush3.bf16.msra.mxu1 %v2480_v5 }
 0x123   : > { %841 = vrot.lane.b32.xlu0 %v2191_v11, %s2575_s24  ;;  %v760_v19 = vshrl.u32 %v704_v10, 16  ;;  %v763_v21 = vshll.u32 %v704_v10, 16  ;;  %v1156_v20 = vld [vmem:[#allocation2 + $0x2c] sm:$0x1]  ;;  %v1308_v35 = vrot.slane %v1307_v14, 4  ;;  %v748_v44 = vrot.slane %v746_v16, 4 }
 0x124   : > { %986 = vrot.lane.b32.xlu1 %v2467_v26, %s2573_s19  ;;  %v751_v45 = vrot.slane %v749_v18, 5  ;;  %v769_v23 = vshll.u32 %v705_v13, 16  ;;  %v1535_v24 = vld [vmem:[#allocation3 + $0x58] sm:$0xff]  ;;  %v1157_v32 = vld [vmem:[#allocation2 + $0x30] sm:$0xe]  ;;  %v1322_v37 = vrot.slane %v1321_v27, 4 }
 0x125   : > { %v757_v25 = vrot.slane %v755_v30, 5  ;;  %v762_v28 = vrot.slane %v760_v19, 4  ;;  %v765_v29 = vrot.slane %v763_v21, 5  ;;  %v1158_v33 = vld [vmem:[#allocation2 + $0x34] sm:$0x1]  ;;  %v1313_v22 = vsel %vm2889_vm9, %v1308_v35, %v1312_v54  ;;  %v2481_v58 = vld [vmem:[%s3200_s4 + $0x68] sm:$0xff]  }
 0x126   : > { %v752_v38 = vor.u32 %v751_v45, %v748_v44  ;;  %v771_v39 = vrot.slane %v769_v23, 5  ;;  %v2219_v40 = vrot.slane %v1155_v12, 9  ;;  %v866_v41 = vld [vmem:[#allocation2 + $0x20] sm:$0xe]  ;;  %v867_v42 = vld [vmem:[#allocation2 + $0x24] sm:$0x1]  ;;  %v1327_v46 = vsel %vm2889_vm9, %v1322_v37, %v1326_v15  ;;  %2318 = vmatprep.subr.bf16.mxu1 %v2481_v58 }
 0x127   : > { %1272 = vrot.lane.b32.xlu0 %v2466_v17, %s2574_s20  ;;  %v766_v47 = vor.u32 %v765_v29, %v762_v28  ;;  %v1197_v48 = vrot.slane %v1156_v20, 5  ;;  %v2220_v51 = vrot.slane %v1157_v32, 9  ;;  %v868_v55 = vld [vmem:[#allocation2 + $0x28] sm:$0xe]  ;;  %v869_v56 = vld [vmem:[#allocation2 + $0x2c] sm:$0x1]  ;;  %v2231_v59 = vcombine.low %v1313_v22, %v1327_v46  ;;  %2319 = vmatpush3.bf16.msra.mxu1 %v2482_v34 }
 0x128   : > { %2381 = vmatmul.mubr.msk.bf16.gmra.mrb[12].mxu0 %vm375_vm0, %v1535_v24  ;;  %v753_v60 = vrot.slane %v752_v38, 4  ;;  %v1201_v61 = vrot.slane %v1158_v33, 5  ;;  %v2199_v62 = vrot.slane %v866_v41, 9  ;;  %v1288_v63 = vld [vmem:[#allocation2 + $0x20] sm:$0xf]  ;;  %v911_v52 = vrot.slane %v867_v42, 5 }
 0x129   : > { %v767_v1 = vrot.slane %v766_v47, 4  ;;  %v1198_v31 = vsel %vm2820_vm6, %v2219_v40, %v1197_v48  ;;  %v2200_v3 = vrot.slane %v868_v55, 9  ;;  %v1289_v4 = vld [vmem:[#allocation2 + $0x24] sm:$0x1]  ;;  %v915_v26 = vrot.slane %v869_v56, 5  ;;  %v2484_v33 = vld [vmem:[%s3200_s4 + $0x70] sm:$0xff]  }
 0x12a   : > { %v758_v6 = vsel %vm2889_vm9, %v753_v60, %v757_v25  ;;  %v1202_v49 = vsel %vm2820_vm6, %v2220_v51, %v1201_v61  ;;  %v1290_v7 = vld [vmem:[#allocation2 + $0x28] sm:$0xf]  ;;  %v1329_v8 = vshrl.u32 %v1288_v63, 16  ;;  %v912_v11 = vsel %vm2820_vm6, %v2199_v62, %v911_v52  ;;  %v1291_v53 = vld [vmem:[#allocation2 + $0x2c] sm:$0x1]  ;;  %2320 = vmatprep.subr.bf16.mxu1 %v2484_v33  ;;  %v2485_v55 = vld [vmem:[%s3200_s4 + $0x30] sm:$0xff]  }
 0x12b   : > { %1424 = vrot.lane.b32.xlu0 %v2231_v59, %s2573_s19  ;;  %v772_v9 = vsel %vm2889_vm9, %v767_v1, %v771_v39  ;;  %v2225_v10 = vcombine.low %v1198_v31, %v1202_v49  ;;  %v1332_v54 = vshll.u32 %v1288_v63, 16  ;;  %v706_v57 = vld [vmem:[#allocation2 + $0x20] sm:$0xf]  ;;  %v916_v14 = vsel %vm2820_vm6, %v2200_v3, %v915_v26  ;;  %v707_v18 = vld [vmem:[#allocation2 + $0x24] sm:$0x1]  ;;  %v2486_v63 = vld [vmem:[%s3200_s4 + $0x78] sm:$0xff]   ;;  %2321 = vmatpush3.bf16.msra.mxu1 %v2485_v55 }
 0x12c   : > { %v2192_v13 = vcombine.low %v758_v6, %v772_v9  ;;  %v1331_v15 = vrot.slane %v1329_v8, 4  ;;  %v1338_v16 = vshll.u32 %v1289_v4, 16  ;;  %v708_v12 = vld [vmem:[#allocation2 + $0x28] sm:$0xf]  ;;  %v2205_v17 = vcombine.low %v912_v11, %v916_v14  ;;  %v709_v21 = vld [vmem:[#allocation2 + $0x2c] sm:$0x1]  ;;  %2322 = vmatprep.subr.bf16.mxu1 %v2486_v63 }
 0x12d   : > { %v1334_v27 = vrot.slane %v1332_v54, 5  ;;  %v1343_v30 = vshrl.u32 %v1290_v7, 16  ;;  %v1346_v19 = vshll.u32 %v1290_v7, 16  ;;  %v1159_v20 = vld [vmem:[#allocation2 + $0x38] sm:$0xe]  ;;  %v1352_v44 = vshll.u32 %v1291_v53, 16 }
 0x12e   : > { %843 = vrot.lane.b32.xlu1 %v2192_v13, %s2575_s24  ;;  %v1340_v35 = vrot.slane %v1338_v16, 5  ;;  %v774_v45 = vshrl.u32 %v706_v57, 16  ;;  %v777_v23 = vshll.u32 %v706_v57, 16  ;;  %v1160_v24 = vld [vmem:[#allocation2 + $0x3c] sm:$0x1]  ;;  %v783_v28 = vshll.u32 %v707_v18, 16 }
 0x12f   : > { %1227 = vrot.lane.b32.xlu0 %v2225_v10, %s2575_s24  ;;  %v1335_v32 = vor.u32 %v1334_v27, %v1331_v15  ;;  %v1345_v37 = vrot.slane %v1343_v30, 4  ;;  %v1348_v25 = vrot.slane %v1346_v19, 5  ;;  %v1161_v29 = vld [vmem:[#allocation2 + $0x40] sm:$0xe]  ;;  %v1354_v22 = vrot.slane %v1352_v44, 5  ;;  %v2487_v4 = vld [vmem:[%s3200_s4 + $0x38] sm:$0xff]  }
 0x130   : > { %v776_v38 = vrot.slane %v774_v45, 4  ;;  %v779_v39 = vrot.slane %v777_v23, 5  ;;  %v788_v40 = vshrl.u32 %v708_v12, 16  ;;  %v1162_v41 = vld [vmem:[#allocation2 + $0x44] sm:$0x1]  ;;  %v785_v47 = vrot.slane %v783_v28, 5  ;;  %2323 = vmatpush3.bf16.msra.mxu1 %v2487_v4 }
 0x131   : > { %v1336_v42 = vrot.slane %v1335_v32, 4  ;;  %v1349_v46 = vor.u32 %v1348_v25, %v1345_v37  ;;  %v791_v48 = vshll.u32 %v708_v12, 16  ;;  %v870_v51 = vld [vmem:[#allocation2 + $0x30] sm:$0xe]  ;;  %v797_v60 = vshll.u32 %v709_v21, 16 }
 0x132   : > { %941 = vrot.lane.b32.xlu1 %v2205_v17, %s2574_s20  ;;  %v780_v56 = vor.u32 %v779_v39, %v776_v38  ;;  %v790_v59 = vrot.slane %v788_v40, 4  ;;  %v2221_v61 = vrot.slane %v1159_v20, 9  ;;  %v871_v62 = vld [vmem:[#allocation2 + $0x34] sm:$0x1]  ;;  %v1205_v52 = vrot.slane %v1160_v24, 5 }
 0x133   : > { %v1341_v0 = vsel %vm2889_vm9, %v1336_v42, %v1340_v35  ;;  %v1350_v1 = vrot.slane %v1349_v46, 4  ;;  %v793_v31 = vrot.slane %v791_v48, 5  ;;  %v872_v3 = vld [vmem:[#allocation2 + $0x38] sm:$0xe]  ;;  %v799_v6 = vrot.slane %v797_v60, 5 }
 0x134   : > { %v781_v5 = vrot.slane %v780_v56, 4  ;;  %v2222_v49 = vrot.slane %v1161_v29, 9  ;;  %v1209_v26 = vrot.slane %v1162_v41, 5  ;;  %v873_v7 = vld [vmem:[#allocation2 + $0x3c] sm:$0x1]  ;;  %v1206_v10 = vsel %vm2820_vm6, %v2221_v61, %v1205_v52 }
 0x135   : > { %v1355_v8 = vsel %vm2889_vm9, %v1350_v1, %v1354_v22  ;;  %v794_v9 = vor.u32 %v793_v31, %v790_v59  ;;  %v2201_v11 = vrot.slane %v870_v51, 9  ;;  %v1292_v53 = vld [vmem:[#allocation2 + $0x30] sm:$0xf]  ;;  %v1293_v54 = vld [vmem:[#allocation2 + $0x34] sm:$0x1]  ;;  %v919_v14 = vrot.slane %v871_v62, 5 }
 0x136   : > { %v2232_v57 = vcombine.low %v1341_v0, %v1355_v8  ;;  %v786_v58 = vsel %vm2889_vm9, %v781_v5, %v785_v47  ;;  %v1210_v13 = vsel %vm2820_vm6, %v2222_v49, %v1209_v26  ;;  %v1294_v15 = vld [vmem:[#allocation2 + $0x38] sm:$0xf]  ;;  %v2202_v12 = vrot.slane %v872_v3, 9  ;;  %v1295_v27 = vld [vmem:[#allocation2 + $0x3c] sm:$0x1] }
 0x137   : > { %v795_v16 = vrot.slane %v794_v9, 4  ;;  %v2226_v18 = vcombine.low %v1206_v10, %v1210_v13  ;;  %v923_v17 = vrot.slane %v873_v7, 5  ;;  %v920_v30 = vsel %vm2820_vm6, %v2201_v11, %v919_v14  ;;  %v710_v34 = vld [vmem:[#allocation2 + $0x30] sm:$0xf]  ;;  %v711_v24 = vld [vmem:[#allocation2 + $0x34] sm:$0x1] }
 0x138   : > { %1426 = vrot.lane.b32.xlu0 %v2232_v57, %s2573_s19  ;;  %v1357_v19 = vshrl.u32 %v1292_v53, 16  ;;  %v1360_v21 = vshll.u32 %v1292_v53, 16  ;;  %v1366_v20 = vshll.u32 %v1293_v54, 16  ;;  %v1371_v45 = vshrl.u32 %v1294_v15, 16  ;;  %v712_v32 = vld [vmem:[#allocation2 + $0x38] sm:$0xf] }
 0x139   : > { %v800_v35 = vsel %vm2889_vm9, %v795_v16, %v799_v6  ;;  %v924_v44 = vsel %vm2820_vm6, %v2202_v12, %v923_v17  ;;  %v1374_v23 = vshll.u32 %v1294_v15, 16  ;;  %v713_v33 = vld [vmem:[#allocation2 + $0x3c] sm:$0x1]  ;;  %v1380_v40 = vshll.u32 %v1295_v27, 16  ;;  %v1296_v62 = vld [vmem:[#allocation2 + $0x40] sm:$0xf] }
 0x13a   : > { %v2193_v37 = vcombine.low %v786_v58, %v800_v35  ;;  %v2206_v25 = vcombine.low %v920_v30, %v924_v44  ;;  %v1359_v28 = vrot.slane %v1357_v19, 4  ;;  %v1362_v29 = vrot.slane %v1360_v21, 5  ;;  %v1297_v52 = vld [vmem:[#allocation2 + $0x44] sm:$0x1]  ;;  %v1003_v49 = vld [vmem:[#allocation2 + $0x18] sm:$0xf] }
 0x13b   : > { %v1368_v22 = vrot.slane %v1366_v20, 5  ;;  %v1373_v38 = vrot.slane %v1371_v45, 4  ;;  %v1376_v39 = vrot.slane %v1374_v23, 5  ;;  %v802_v2 = vshrl.u32 %v710_v34, 16  ;;  %v1004_v10 = vld [vmem:[#allocation2 + $0x1c] sm:$0x1] }
 0x13c   : > { %845 = vrot.lane.b32.xlu1 %v2193_v37, %s2575_s24  ;;  %1229 = vrot.lane.b32.xlu0 %v2226_v18, %s2575_s24  ;;  %v1363_v41 = vor.u32 %v1362_v29, %v1359_v28  ;;  %v805_v42 = vshll.u32 %v710_v34, 16  ;;  %v811_v46 = vshll.u32 %v711_v24, 16  ;;  %v1382_v48 = vrot.slane %v1380_v40, 5  ;;  %v1006_v11 = vld [vmem:[#allocation2 + $0x24] sm:$0x1] }
 0x13d   : > { %v1377_v47 = vor.u32 %v1376_v39, %v1373_v38  ;;  %v816_v51 = vshrl.u32 %v712_v32, 16  ;;  %v819_v55 = vshll.u32 %v712_v32, 16  ;;  %v804_v59 = vrot.slane %v802_v2, 4  ;;  %v1005_v13 = vld [vmem:[#allocation2 + $0x20] sm:$0xf] }
 0x13e   : > { %v1364_v56 = vrot.slane %v1363_v41, 4  ;;  %v807_v60 = vrot.slane %v805_v42, 5  ;;  %v813_v61 = vrot.slane %v811_v46, 5  ;;  %v825_v31 = vshll.u32 %v713_v33, 16  ;;  %v999_v18 = vld [vmem:[#allocation2 + $0x8] sm:$0xf] }
 0x13f   : > { %v1378_v63 = vrot.slane %v1377_v47, 4  ;;  %v818_v0 = vrot.slane %v816_v51, 4  ;;  %v821_v1 = vrot.slane %v819_v55, 5  ;;  %v1385_v5 = vshrl.u32 %v1296_v62, 16  ;;  %v2468_v17 = vld [vmem:[#allocation2 + $0x40] ss:$8 sps:$4 sm:$0xff]  }
 0x140   : > { %943 = vrot.lane.b32.xlu1 %v2206_v25, %s2574_s20  ;;  %v1369_v3 = vsel %vm2889_vm9, %v1364_v56, %v1368_v22  ;;  %v808_v4 = vor.u32 %v807_v60, %v804_v59  ;;  %v1388_v6 = vshll.u32 %v1296_v62, 16  ;;  %v827_v8 = vrot.slane %v825_v31, 5  ;;  %v1000_v21 = vld [vmem:[#allocation2 + $0xc] sm:$0x1]  ;;  %v1002_v20 = vld [vmem:[#allocation2 + $0x14] sm:$0x1] }
 0x141   : > { %v1383_v26 = vsel %vm2889_vm9, %v1378_v63, %v1382_v48  ;;  %v822_v7 = vor.u32 %v821_v1, %v818_v0  ;;  %v1394_v9 = vshll.u32 %v1297_v52, 16  ;;  %v1387_v57 = vrot.slane %v1385_v5, 4  ;;  %v1001_v25 = vld [vmem:[#allocation2 + $0x10] sm:$0xf]  ;;  %v2478_v28 = vld [vmem:[#allocation2] ss:$8 sps:$4 sm:$0xff]  }
 0x142   : > { %v2233_v53 = vcombine.low %v1369_v3, %v1383_v26  ;;  %v809_v54 = vrot.slane %v808_v4, 4  ;;  %v1390_v58 = vrot.slane %v1388_v6, 5  ;;  %v1044_v15 = vshrl.u32 %v1003_v49, 16  ;;  %v2469_v39 = vld [vmem:[#allocation2 + $0x38] ss:$8 sps:$4 sm:$0xff]   ;;  %694 = vst.msk [vmem:[#allocation3] sm:$0xff] %vm375_vm0, %v2478_v28 }
 0x143   : > { %v823_v14 = vrot.slane %v822_v7, 4  ;;  %v1047_v16 = vshll.u32 %v1003_v49, 16  ;;  %v1396_v30 = vrot.slane %v1394_v9, 5  ;;  %v1053_v19 = vshll.u32 %v1004_v10, 16  ;;  %v2483_v47 = vld [vmem:[#allocation2 + $0x10] ss:$8 sps:$4 sm:$0xff]  }
 0x144   : > { %1428 = vrot.lane.b32.xlu0 %v2233_v53, %s2573_s19  ;;  %v814_v12 = vsel %vm2889_vm9, %v809_v54, %v813_v61  ;;  %v1391_v27 = vor.u32 %v1390_v58, %v1387_v57  ;;  %v1046_v35 = vrot.slane %v1044_v15, 4  ;;  %v1058_v45 = vshrl.u32 %v1005_v13, 16  ;;  %v1007_v59 = vld [vmem:[#allocation2 + $0x28] sm:$0xf]  ;;  %695 = vst.msk [vmem:[#allocation3 + $0x18] sm:$0xff] %vm375_vm0, %v2483_v47 }
 0x145   : > { %v828_v34 = vsel %vm2889_vm9, %v823_v14, %v827_v8  ;;  %v1049_v44 = vrot.slane %v1047_v16, 5  ;;  %v1411_v32 = vsel %vm2889_vm9, %v2898_v43, %v2905_v50  ;;  %v1067_v37 = vshll.u32 %v1006_v11, 16  ;;  %v1008_v0 = vld [vmem:[#allocation2 + $0x2c] sm:$0x1]  ;;  %v1010_v52 = vld [vmem:[#allocation2 + $0x34] sm:$0x1] }
 0x146   : > { %v2194_v23 = vcombine.low %v814_v12, %v828_v34  ;;  %v1392_v24 = vrot.slane %v1391_v27, 4  ;;  %v1060_v33 = vrot.slane %v1058_v45, 4  ;;  %v1061_v22 = vshll.u32 %v1005_v13, 16  ;;  %v1009_v4 = vld [vmem:[#allocation2 + $0x30] sm:$0xf] }
 0x147   : > { %v1050_v29 = vor.u32 %v1049_v44, %v1046_v35  ;;  %v1016_v38 = vshrl.u32 %v999_v18, 16  ;;  %v1019_v41 = vshll.u32 %v999_v18, 16  ;;  %v1025_v2 = vshll.u32 %v1000_v21, 16  ;;  %v2488_v58 = vld [vmem:[#allocation2 + $0x20] ss:$8 sps:$4 sm:$0xff]  }
 0x148   : > { %847 = vrot.lane.b32.xlu1 %v2194_v23, %s2575_s24  ;;  %1274 = vrot.lane.b32.xlu0 %v2468_v17, %s2574_s20  ;;  %v1397_v40 = vsel %vm2889_vm9, %v1392_v24, %v1396_v30  ;;  %v1055_v43 = vrot.slane %v1053_v19, 5  ;;  %v1063_v50 = vrot.slane %v1061_v22, 5  ;;  %v1039_v46 = vshll.u32 %v1002_v20, 16  ;;  %v1011_v13 = vld [vmem:[#allocation2 + $0x38] sm:$0xf]  ;;  %696 = vst.msk [vmem:[#allocation3 + $0x30] sm:$0xff] %vm375_vm0, %v2488_v58  ;;  %s3138_s20 = scalar_lea.hbm %s3206_s10, %s2301_s30 }
 0x149   : > { %v1018_v42 = vrot.slane %v1016_v38, 4  ;;  %v2234_v48 = vcombine.low %v1397_v40, %v1411_v32  ;;  %v1051_v51 = vrot.slane %v1050_v29, 4  ;;  %v1021_v55 = vrot.slane %v1019_v41, 5  ;;  %v1012_v18 = vld [vmem:[#allocation2 + $0x3c] sm:$0x1]  ;;  %s2577_s24 = smov [#allocation5]  }
 0x14a   : > { %v1030_v56 = vshrl.u32 %v1001_v25, 16  ;;  %v1069_v60 = vrot.slane %v1067_v37, 5  ;;  %v1064_v61 = vor.u32 %v1063_v50, %v1060_v33  ;;  %v1027_v62 = vrot.slane %v1025_v2, 5  ;;  %v1013_v12 = vld [vmem:[#allocation2 + $0x40] sm:$0xf]  ;;  %s2496_s28 = sshll.u32 %s2577_s24, 4  ;;  %s2497_s28 = int_to_ptr.vmem [resolvable:$false] %s2496_s28 }
 0x14b   : > { %v1033_v63 = vshll.u32 %v1001_v25, 16  ;;  %v1022_v1 = vor.u32 %v1021_v55, %v1018_v42  ;;  %v1072_v3 = vshrl.u32 %v1007_v59, 16  ;;  %v1041_v6 = vrot.slane %v1039_v46, 5  ;;  %v1014_v19 = vld [vmem:[#allocation2 + $0x44] sm:$0x1]  ;;  %s2498_s30 = scalar_lea.vmem %s2497_s28, 2048  ;;  %p2499_p1 = scmp.lt.s32.totalorder %s3140_s11, %s2497_s28 }
 0x14c   : > { %988 = vrot.lane.b32.xlu1 %v2469_v39, %s2573_s19  ;;  %1430 = vrot.lane.b32.xlu0 %v2234_v48, %s2573_s19  ;;  %v1032_v31 = vrot.slane %v1030_v56, 4  ;;  %v1065_v5 = vrot.slane %v1064_v61, 4  ;;  %v1075_v26 = vshll.u32 %v1007_v59, 16  ;;  %v1056_v7 = vsel %vm2889_vm9, %v1051_v51, %v1055_v43  ;;  %v2489_v33 = vld [vmem:[#allocation2 + $0x30] ss:$8 sps:$4 sm:$0xff]  }
 0x14d   : > { %v1035_v49 = vrot.slane %v1033_v63, 5  ;;  %v1074_v8 = vrot.slane %v1072_v3, 4  ;;  %v1081_v9 = vshll.u32 %v1008_v0, 16  ;;  %v1086_v10 = vshrl.u32 %v1009_v4, 16  ;;  %697 = vst.msk [vmem:[#allocation3 + $0x48] sm:$0xff] %vm375_vm0, %v2489_v33 }
 0x14e   : > { %v1070_v11 = vsel %vm2889_vm9, %v1065_v5, %v1069_v60  ;;  %v1023_v53 = vrot.slane %v1022_v1, 4  ;;  %v1077_v57 = vrot.slane %v1075_v26, 5  ;;  %v1095_v15 = vshll.u32 %v1010_v52, 16 }
 0x14f   : > { %v1036_v54 = vor.u32 %v1035_v49, %v1032_v31  ;;  %v2212_v14 = vcombine.low %v1056_v7, %v1070_v11  ;;  %v1088_v16 = vrot.slane %v1086_v10, 4  ;;  %v1089_v30 = vshll.u32 %v1009_v4, 16 }
 0x150   : > { %v1078_v27 = vor.u32 %v1077_v57, %v1074_v8  ;;  %v1100_v21 = vshrl.u32 %v1011_v13, 16  ;;  %v1103_v20 = vshll.u32 %v1011_v13, 16  ;;  %v1109_v34 = vshll.u32 %v1012_v18, 16 }
 0x151   : > { %v1037_v17 = vrot.slane %v1036_v54, 4  ;;  %1144 = vst.msk [vmem:[#allocation3 + $0x20] sm:$0xff] %vm375_vm0, %v2212_v14  ;;  %v1114_v35 = vshrl.u32 %v1013_v12, 16  ;;  %v1117_v44 = vshll.u32 %v1013_v12, 16  ;;  %v1028_v45 = vsel %vm2889_vm9, %v1023_v53, %v1027_v62 }
 0x152   : > { %v1091_v24 = vrot.slane %v1089_v30, 5  ;;  %v1102_v32 = vrot.slane %v1100_v21, 4  ;;  %v1083_v25 = vrot.slane %v1081_v9, 5  ;;  %v1105_v28 = vrot.slane %v1103_v20, 5 }
 0x153   : > { %v1042_v23 = vsel %vm2889_vm9, %v1037_v17, %v1041_v6  ;;  %v1116_v29 = vrot.slane %v1114_v35, 4  ;;  %v1079_v22 = vrot.slane %v1078_v27, 4  ;;  %v1119_v39 = vrot.slane %v1117_v44, 5 }
 0x154   : > { %v2211_v37 = vcombine.low %v1028_v45, %v1042_v23  ;;  %v1092_v38 = vor.u32 %v1091_v24, %v1088_v16  ;;  %v1123_v40 = vshll.u32 %v1014_v19, 16  ;;  %v1106_v41 = vor.u32 %v1105_v28, %v1102_v32  ;;  %v2490_v32 = vld [vmem:[%s3203_s7] sm:$0xff]  }
 0x155   : > { %v1111_v2 = vrot.slane %v1109_v34, 5  ;;  %v1097_v43 = vrot.slane %v1095_v15, 5  ;;  %v1120_v42 = vor.u32 %v1119_v39, %v1116_v29  ;;  %v1084_v48 = vsel %vm2889_vm9, %v1079_v22, %v1083_v25  ;;  %2384 = vmatprep.subr.bf16.mxu0 %v2490_v32 }
 0x156   : > { %1143 = vst.msk [vmem:[#allocation3 + $0x8] sm:$0xff] %vm375_vm0, %v2211_v37  ;;  %v1093_v50 = vrot.slane %v1092_v38, 4  ;;  %v1125_v46 = vrot.slane %v1123_v40, 5  ;;  %v1107_v47 = vrot.slane %v1106_v41, 4  ;;  %2385 = vmatpush3.bf16.msra.mxu0 %v2490_v32  ;;  %v2491_v37 = vld [vmem:[%s3203_s7 + $0x8] sm:$0xff]   ;;  %v2576_v25 = vmov 0.0  }
 0x157   : > { %v1121_v55 = vrot.slane %v1120_v42, 4  ;;  %2386 = vmatprep.subr.bf16.mxu0 %v2491_v37  ;;  %378 = vst.msk [vmem:[#allocation4 + $0x10] sm:$0xff] %vm375_vm0, %v2576_v25  ;;  %376 = vst.msk [vmem:[#allocation4] sm:$0xff] %vm375_vm0, %v2576_v25  ;;  %v2269_v38 = vld [vmem:[%s3201_s5] ss:$0 sm:$0xff] }
 0x158   : > { %v1098_v51 = vsel %vm2889_vm9, %v1093_v50, %v1097_v43  ;;  %v1112_v59 = vsel %vm2889_vm9, %v1107_v47, %v1111_v2  ;;  %377 = vst.msk [vmem:[#allocation4 + $0x8] sm:$0xff] %vm375_vm0, %v2576_v25  ;;  %379 = vst.msk [vmem:[#allocation4 + $0x18] sm:$0xff] %vm375_vm0, %v2576_v25  ;;  %v2270_v2 = vld [vmem:[%s3202_s6] ss:$0 sm:$0xff] }
 0x159   : > { %v2213_v56 = vcombine.low %v1084_v48, %v1098_v51  ;;  %v1126_v60 = vsel %vm2889_vm9, %v1121_v55, %v1125_v46  ;;  %380 = vst.msk [vmem:[#allocation4 + $0x20] sm:$0xff] %vm375_vm0, %v2576_v25  ;;  %381 = vst.msk [vmem:[#allocation4 + $0x28] sm:$0xff] %vm375_vm0, %v2576_v25 }
 0x15a   : > { %v2214_v61 = vcombine.low %v1112_v59, %v1126_v60  ;;  %2387 = vmatpush3.bf16.msra.mxu0 %v2491_v37  ;;  %382 = vst.msk [vmem:[#allocation4 + $0x30] sm:$0xff] %vm375_vm0, %v2576_v25  ;;  %383 = vst.msk [vmem:[#allocation4 + $0x38] sm:$0xff] %vm375_vm0, %v2576_v25 }
 0x15b   : > { %1145 = vst.msk [vmem:[#allocation3 + $0x38] sm:$0xff] %vm375_vm0, %v2213_v56 }
 0x15c   : > { %1146 = vst.msk [vmem:[#allocation3 + $0x50] sm:$0xff] %vm375_vm0, %v2214_v61 }
 0x17b   : > { %v985_v62 = vpop.permute.xlu1 %984 }
 0x181   : > { %v1269_v63 = vpop.permute.xlu1 %1268 }
 0x184   : > { %v1226_v0 = vpop.permute.xlu0 %1225 }
 0x185   : > { %1236 = vst.msk [vmem:[#allocation3 + $0x20] sm:$0xff] %vm853_vm10, %v1226_v0  ;;  %v983_v31 = vpop.permute.xlu1 %982 }
 0x188   : > { %v1224_v1 = vpop.permute.xlu0 %1223 }
 0x189   : > { %1235 = vst.msk [vmem:[#allocation3 + $0x8] sm:$0xff] %vm853_vm10, %v1224_v1 }
 0x18a   : > { %1280 = vst.msk [vmem:[#allocation3 + $0x8] sm:$0xff] %vm949_vm11, %v1269_v63 }
 0x18c   : > { %v1271_v36 = vpop.permute.xlu0 %1270 }
 0x18d   : > { %1281 = vst.msk [vmem:[#allocation3 + $0x20] sm:$0xff] %vm949_vm11, %v1271_v36 }
 0x18e   : > { %v938_v52 = vpop.permute.xlu1 %937 }
 0x192   : > { %v940_v3 = vpop.permute.xlu1 %939 }
 0x195   : > { %v842_v4 = vpop.permute.xlu0 %841 }
 0x196   : > { %854 = vst.msk [vmem:[#allocation3] sm:$0xff] %vm853_vm10, %v842_v4  ;;  %v987_v6 = vpop.permute.xlu1 %986 }
 0x197   : > { %950 = vst.msk [vmem:[#allocation3] sm:$0xff] %vm949_vm11, %v938_v52 }
 0x198   : > { %995 = vst.msk [vmem:[#allocation3] sm:$0xff] %vm994_vm12, %v983_v31 }
 0x199   : > { %v1273_v5 = vpop.permute.xlu0 %1272 }
 0x19d   : > { %v1425_v49 = vpop.permute.xlu0 %1424 }
 0x19e   : > { %1436 = vst.msk [vmem:[#allocation3 + $0x8] sm:$0xff] %vm994_vm12, %v1425_v49 }
 0x19f   : > { %v1524_v9 = vld [vmem:[#allocation3] sm:$0xff] }
 0x1a0   : > { %v844_v26 = vpop.permute.xlu1 %843 }
 0x1a1   : > { %855 = vst.msk [vmem:[#allocation3 + $0x18] sm:$0xff] %vm853_vm10, %v844_v26  ;;  %v1228_v7 = vpop.permute.xlu0 %1227 }
 0x1a2   : > { %951 = vst.msk [vmem:[#allocation3 + $0x18] sm:$0xff] %vm949_vm11, %v940_v3 }
 0x1a3   : > { %1237 = vst.msk [vmem:[#allocation3 + $0x38] sm:$0xff] %vm853_vm10, %v1228_v7 }
 0x1a4   : > { %996 = vst.msk [vmem:[#allocation3 + $0x18] sm:$0xff] %vm994_vm12, %v985_v62  ;;  %v942_v10 = vpop.permute.xlu1 %941 }
 0x1a5   : > { %1282 = vst.msk [vmem:[#allocation3 + $0x38] sm:$0xff] %vm949_vm11, %v1273_v5  ;;  %v1525_v8 = vld [vmem:[#allocation3 + $0x8] sm:$0xff] }
 0x1a6   : > { %1727 = vmatprep.mubr.bf16.mxu1 %v1525_v8 }
 0x1a7   : > { %1728 = vmatmul.mubr.bf16.vlgmr.msra.gmra.mrb[0].mxu1 %v1524_v9 }
 0x1aa   : > { %v1427_v11 = vpop.permute.xlu0 %1426 }
 0x1ab   : > { %1437 = vst.msk [vmem:[#allocation3 + $0x20] sm:$0xff] %vm994_vm12, %v1427_v11  ;;  %v1527_v58 = vld [vmem:[#allocation3 + $0x18] sm:$0xff] }
 0x1ae   : > { %v846_v53 = vpop.permute.xlu1 %845  ;;  %v1230_v54 = vpop.permute.xlu0 %1229 }
 0x1af   : > { %856 = vst.msk [vmem:[#allocation3 + $0x30] sm:$0xff] %vm853_vm10, %v846_v53  ;;  %1238 = vst.msk [vmem:[#allocation3 + $0x50] sm:$0xff] %vm853_vm10, %v1230_v54 }
 0x1b0   : > { %952 = vst.msk [vmem:[#allocation3 + $0x30] sm:$0xff] %vm949_vm11, %v942_v10 }
 0x1b1   : > { %997 = vst.msk [vmem:[#allocation3 + $0x30] sm:$0xff] %vm994_vm12, %v987_v6 }
 0x1b2   : > { %v1528_v57 = vld [vmem:[#allocation3 + $0x20] sm:$0xff]  ;;  %v944_v13 = vpop.permute.xlu1 %943 }
 0x1b3   : > { %1735 = vmatprep.mubr.bf16.mxu1 %v1528_v57 }
 0x1b4   : > { %1736 = vmatmul.mubr.bf16.gmra.mrb[4].mxu1 %v1527_v58 }
 0x1b6   : > { %v1429_v14 = vpop.permute.xlu0 %1428 }
 0x1b7   : > { %1438 = vst.msk [vmem:[#allocation3 + $0x38] sm:$0xff] %vm994_vm12, %v1429_v14 }
 0x1b8   : > { %v1530_v27 = vld [vmem:[#allocation3 + $0x30] sm:$0xff] }
 0x1ba   : > { %v848_v15 = vpop.permute.xlu1 %847  ;;  %v1275_v16 = vpop.permute.xlu0 %1274 }
 0x1bb   : > { %857 = vst.msk [vmem:[#allocation3 + $0x48] sm:$0xff] %vm853_vm10, %v848_v15 }
 0x1bc   : > { %1283 = vst.msk [vmem:[#allocation3 + $0x50] sm:$0xff] %vm949_vm11, %v1275_v16  ;;  %953 = vst.msk [vmem:[#allocation3 + $0x48] sm:$0xff] %vm949_vm11, %v944_v13 }
 0x1be   : > { %v989_v18 = vpop.permute.xlu1 %988  ;;  %v1431_v12 = vpop.permute.xlu0 %1430  ;;  %v1531_v17 = vld [vmem:[#allocation3 + $0x38] sm:$0xff] }
 0x1bf   : > { %998 = vst.msk [vmem:[#allocation3 + $0x48] sm:$0xff] %vm994_vm12, %v989_v18  ;;  %1439 = vst.msk [vmem:[#allocation3 + $0x50] sm:$0xff] %vm994_vm12, %v1431_v12  ;;  %1743 = vmatprep.mubr.bf16.mxu1 %v1531_v17 }
 0x1c0   : > { %1744 = vmatmul.mubr.bf16.gmra.mrb[8].mxu1 %v1530_v27 }
 0x1c6   : > { %v1534_v30 = vld [vmem:[#allocation3 + $0x50] sm:$0xff]  ;;  %v1533_v19 = vld [vmem:[#allocation3 + $0x48] sm:$0xff] }
 0x1c7   : > { %1751 = vmatprep.mubr.bf16.mxu1 %v1534_v30 }
 0x1c8   : > { %1752 = vmatmul.mubr.bf16.gmra.mrb[12].mxu1 %v1533_v19 }
 0x1f3   : > { %v2378_v21 = vpop.f32.mrb[8].mxu0 }
 0x1f4   : > { %v1794_v20 = vpop.f32.mrb[9].mxu0 }
 0x1f5   : > { %v2379_v34 = vpop.f32.mrb[10].mxu0 }
 0x1f6   : > { %v1797_v35 = vpop.f32.mrb[11].mxu0 }
 0x1fb   : > { %v3056_v44 = vpop.f32.mrb[12].mxu0 }
 0x1fc   : > { %v1810_v45 = vpop.f32.mrb[13].mxu0 }
 0x1fd   : > { %v3058_v23 = vpop.f32.mrb[14].mxu0 }
 0x1fe   : > { %v1813_v24 = vpop.f32.mrb[15].mxu0 }
 0x27a   : > { %v2324_v28 = vpop.f32.mrb[0].mxu1 }
 0x27b   : > { %v2325_v29 = vpop.f32.mrb[1].mxu1 }
 0x27c   : > { %v2326_v33 = vadd.f32 %v2325_v29, %v2324_v28  ;;  %v2327_v22 = vpop.f32.mrb[2].mxu1  ;;  %v1867_v28 = vld [vmem:[#allocation4 + $0x10] sm:$0xff]  ;;  %v1865_v29 = vld [vmem:[#allocation4] sm:$0xff] }
 0x27d   : > { %v2328_v39 = vpop.f32.mrb[3].mxu1 }
 0x27e   : > { %v1795_v40 = vadd.f32 %v2326_v33, %v1794_v20  ;;  %v2329_v41 = vadd.f32 %v2328_v39, %v2327_v22  ;;  %v1868_v22 = vld [vmem:[#allocation4 + $0x18] sm:$0xff] }
 0x280   : > { %v1833_v43 = vmul.f32 %v2269_v38, %v1795_v40  ;;  %v1798_v50 = vadd.f32 %v2329_v41, %v1797_v35  ;;  %v1866_v40 = vld [vmem:[#allocation4 + $0x8] sm:$0xff] }
 0x282   : > { %v1849_v42 = vadd.f32 %v2270_v2, %v1833_v43  ;;  %v1834_v46 = vmul.f32 %v2269_v38, %v1798_v50  ;;  %v2277_v50 = vld [vmem:[%s3204_s8] ss:$0 sm:$0xff] }
 0x284   : > { %v1850_v47 = vadd.f32 %v2270_v2, %v1834_v46  ;;  %v1857_v48 = vmax.f32 %v1849_v42, 0.0  ;;  %v3096_v46 = vld [vmem:[%s3205_s9] ss:$0 sm:$0xff] }
 0x286   : > { %v1858_v51 = vmax.f32 %v1850_v47, 0.0 }
 0x287   : > { %v2330_v55 = vpop.f32.mrb[4].mxu1 }
 0x288   : > { %v2331_v56 = vpop.f32.mrb[5].mxu1  ;;  %v1873_v59 = vpack.c.bf16 %v1858_v51, %v1857_v48  ;;  %v2031_v51 = vld [vmem:[%s2701_s22 + $0x10] sm:$0xff] }
 0x289   : > { %v2332_v60 = vadd.f32 %v2331_v56, %v2330_v55  ;;  %v2333_v61 = vpop.f32.mrb[6].mxu1 }
 0x28a   : > { %v2334_v62 = vpop.f32.mrb[7].mxu1  ;;  %2388 = vmatprep.mubr.msk.bf16.mxu0 %vm375_vm0, %v1873_v59 }
 0x28b   : > { %v1803_v63 = vadd.f32 %v2378_v21, %v2332_v60  ;;  %v2335_v0 = vadd.f32 %v2334_v62, %v2333_v61  ;;  %v2029_v60 = vld [vmem:[%s2701_s22] sm:$0xff] }
 0x28d   : > { %v1835_v1 = vmul.f32 %v2269_v38, %v1803_v63  ;;  %v1806_v31 = vadd.f32 %v2379_v34, %v2335_v0  ;;  %v2032_v0 = vld [vmem:[%s2701_s22 + $0x18] sm:$0xff] }
 0x28f   : > { %v1851_v36 = vadd.f32 %v2270_v2, %v1835_v1  ;;  %v1836_v52 = vmul.f32 %v2269_v38, %v1806_v31 }
 0x291   : > { %v1852_v3 = vadd.f32 %v2270_v2, %v1836_v52  ;;  %v1859_v4 = vmax.f32 %v1851_v36, 0.0  ;;  %v2030_v52 = vld [vmem:[%s2701_s22 + $0x8] sm:$0xff] }
 0x293   : > { %v1860_v5 = vmax.f32 %v1852_v3, 0.0  ;;  %v2336_v6 = vpop.f32.mrb[8].mxu1 }
 0x294   : > { %v2337_v49 = vpop.f32.mrb[9].mxu1 }
 0x295   : > { %v1874_v26 = vpack.c.bf16 %v1860_v5, %v1859_v4  ;;  %v2338_v7 = vadd.f32 %v2337_v49, %v2336_v6  ;;  %v2339_v8 = vpop.f32.mrb[10].mxu1 }
 0x296   : > { %v2340_v9 = vpop.f32.mrb[11].mxu1 }
 0x297   : > { %v1811_v10 = vadd.f32 %v2338_v7, %v1810_v45  ;;  %v2341_v11 = vadd.f32 %v2340_v9, %v2339_v8  ;;  %2389 = vmatmul.mubr.msk.bf16.vlgmr.msra.gmra.mrb[16].mxu0 %vm375_vm0, %v1874_v26  ;;  %v1871_v7 = vld [vmem:[#allocation4 + $0x30] sm:$0xff]  ;;  %v1869_v9 = vld [vmem:[#allocation4 + $0x20] sm:$0xff] }
 0x299   : > { %v1837_v53 = vmul.f32 %v2269_v38, %v1811_v10  ;;  %v1814_v54 = vadd.f32 %v2341_v11, %v1813_v24 }
 0x29b   : > { %v1853_v57 = vadd.f32 %v2270_v2, %v1837_v53  ;;  %v1838_v58 = vmul.f32 %v2269_v38, %v1814_v54  ;;  %v2342_v13 = vpop.f32.mrb[12].mxu1  ;;  %v1872_v53 = vld [vmem:[#allocation4 + $0x38] sm:$0xff] }
 0x29c   : > { %v2343_v14 = vpop.f32.mrb[13].mxu1 }
 0x29d   : > { %v1854_v15 = vadd.f32 %v2270_v2, %v1838_v58  ;;  %v2344_v16 = vadd.f32 %v2343_v14, %v2342_v13  ;;  %v2345_v18 = vpop.f32.mrb[14].mxu1  ;;  %v1861_v17 = vmax.f32 %v1853_v57, 0.0  ;;  %v1870_v58 = vld [vmem:[#allocation4 + $0x28] sm:$0xff] }
 0x29e   : > { %v2346_v12 = vpop.f32.mrb[15].mxu1 }
 0x29f   : > { %v1862_v27 = vmax.f32 %v1854_v15, 0.0  ;;  %v1819_v30 = vadd.f32 %v3056_v44, %v2344_v16  ;;  %v2347_v19 = vadd.f32 %v2346_v12, %v2345_v18 }
 0x2a1   : > { %v1839_v21 = vmul.f32 %v2269_v38, %v1819_v30  ;;  %v1822_v20 = vadd.f32 %v3058_v23, %v2347_v19  ;;  %v1875_v34 = vpack.c.bf16 %v1862_v27, %v1861_v17  ;;  %v2035_v30 = vld [vmem:[%s2701_s22 + $0x30] sm:$0xff] }
 0x2a3   : > { %v1855_v35 = vadd.f32 %v2270_v2, %v1839_v21  ;;  %v1840_v45 = vmul.f32 %v2269_v38, %v1822_v20  ;;  %2392 = vmatprep.mubr.msk.bf16.mxu0 %vm375_vm0, %v1875_v34  ;;  %v2033_v34 = vld [vmem:[%s2701_s22 + $0x20] sm:$0xff] }
 0x2a5   : > { %v1856_v24 = vadd.f32 %v2270_v2, %v1840_v45  ;;  %v1863_v32 = vmax.f32 %v1855_v35, 0.0 }
 0x2a7   : > { %v1864_v37 = vmax.f32 %v1856_v24, 0.0 }
 0x2a9   : > { %v1876_v25 = vpack.c.bf16 %v1864_v37, %v1863_v32  ;;  %v2036_v32 = vld [vmem:[%s2701_s22 + $0x38] sm:$0xff] }
 0x2ab   : > { %2393 = vmatmul.mubr.msk.bf16.gmra.mrb[20].mxu0 %vm375_vm0, %v1876_v25 }
 0x36a   : > { %v2390_v33 = vpop.f32.mrb[16].mxu0 }
 0x36b   : > { %v1974_v44 = vadd.f32 %v2390_v33, %v1867_v28  ;;  %v1941_v39 = vpop.f32.mrb[17].mxu0 }
 0x36c   : > { %v1972_v23 = vadd.f32 %v1941_v39, %v1865_v29  ;;  %v2391_v41 = vpop.f32.mrb[18].mxu0  ;;  %v2034_v29 = vld [vmem:[%s2701_s22 + $0x28] sm:$0xff]  ;;  %s2492_s22 = scalar_lea.vmem %s3140_s11, 1024 }
 0x36d   : > { %1982 = vst.msk [vmem:[#allocation4 + $0x10] sm:$0xff] %vm375_vm0, %v1974_v44  ;;  %v1975_v38 = vadd.f32 %v2391_v41, %v1868_v22  ;;  %v1944_v2 = vpop.f32.mrb[19].mxu0  ;;  %p2493_p12 = scmp.ne.s32.totalorder %s3140_s11, %s2492_s22  ;;  %p2500_p2 = scmp.lt.s32.totalorder %s2498_s30, %s2492_s22 }
 0x36e   : > { %1980 = vst.msk [vmem:[#allocation4] sm:$0xff] %vm375_vm0, %v1972_v23  ;;  %v1973_v43 = vadd.f32 %v1944_v2, %v1866_v40 }
 0x36f   : > { %1983 = vst.msk [vmem:[#allocation4 + $0x18] sm:$0xff] %vm375_vm0, %v1975_v38  ;;  %p2494_p13 = pnand %p2493_p12, %p2675_p4  ;;  %p2501_p3 = por %p2500_p2, %p2499_p1 }
 0x370   : > { %1981 = vst.msk [vmem:[#allocation4 + $0x8] sm:$0xff] %vm375_vm0, %v1973_v43 }
 0x371   : > { %p2495_p0 = pneg %p2494_p13 }
 0x373   : > { %p2502_p5 = pnand %p2501_p3, %p2495_p0 }
 0x374   : > { %v1993_v42 = vld [vmem:[#allocation4 + $0x10] sm:$0xff] }
 0x375   : > { %v2008_v47 = vmul.f32 %v2277_v50, %v1993_v42  ;;  %v1991_v48 = vld [vmem:[#allocation4] sm:$0xff] }
 0x376   : > { %v2006_v55 = vmul.f32 %v2277_v50, %v1991_v48  ;;  %v1994_v56 = vld [vmem:[#allocation4 + $0x18] sm:$0xff] }
 0x377   : > { %v2023_v59 = vadd.f32 %v3096_v46, %v2008_v47  ;;  %v2009_v61 = vmul.f32 %v2277_v50, %v1994_v56  ;;  %v1992_v62 = vld [vmem:[#allocation4 + $0x8] sm:$0xff] }
 0x378   : > { %v2021_v63 = vadd.f32 %v3096_v46, %v2006_v55  ;;  %v2007_v1 = vmul.f32 %v2277_v50, %v1992_v62 }
 0x379   : > { %v2039_v31 = vadd.f32 %v2031_v51, %v2023_v59  ;;  %v2024_v36 = vadd.f32 %v3096_v46, %v2009_v61 }
 0x37a   : > { %v2037_v3 = vadd.f32 %v2029_v60, %v2021_v63  ;;  %v2022_v4 = vadd.f32 %v3096_v46, %v2007_v1 }
 0x37b   : > { %v2047_v5 = vmax.f32 %v2039_v31, 0.0  ;;  %v2040_v6 = vadd.f32 %v2032_v0, %v2024_v36 }
 0x37c   : > { %v2045_v49 = vmax.f32 %v2037_v3, 0.0  ;;  %v2038_v26 = vadd.f32 %v2030_v52, %v2022_v4 }
 0x37d   : > { %v2048_v8 = vmax.f32 %v2040_v6, 0.0  ;;  %2055 = vst.msk [vmem:[%s3109_s29 + $0x10] sm:$0xff] %vm375_vm0, %v2047_v5 }
 0x37e   : > { %v2046_v10 = vmax.f32 %v2038_v26, 0.0  ;;  %v2394_v11 = vpop.f32.mrb[20].mxu0  ;;  %2053 = vst.msk [vmem:[%s3109_s29] sm:$0xff] %vm375_vm0, %v2045_v49 }
 0x37f   : > { %v1978_v54 = vadd.f32 %v2394_v11, %v1871_v7  ;;  %v1957_v57 = vpop.f32.mrb[21].mxu0  ;;  %2056 = vst.msk [vmem:[%s3109_s29 + $0x18] sm:$0xff] %vm375_vm0, %v2048_v8 }
 0x380   : > { %v1976_v13 = vadd.f32 %v1957_v57, %v1869_v9  ;;  %v2395_v14 = vpop.f32.mrb[22].mxu0  ;;  %2054 = vst.msk [vmem:[%s3109_s29 + $0x8] sm:$0xff] %vm375_vm0, %v2046_v10 }
 0x381   : > { %1986 = vst.msk [vmem:[#allocation4 + $0x30] sm:$0xff] %vm375_vm0, %v1978_v54  ;;  %v1979_v15 = vadd.f32 %v2395_v14, %v1872_v53  ;;  %v1960_v16 = vpop.f32.mrb[23].mxu0 }
 0x382   : > { %1984 = vst.msk [vmem:[#allocation4 + $0x20] sm:$0xff] %vm375_vm0, %v1976_v13  ;;  %v1977_v18 = vadd.f32 %v1960_v16, %v1870_v58 }
 0x383   : > { %1987 = vst.msk [vmem:[#allocation4 + $0x38] sm:$0xff] %vm375_vm0, %v1979_v15 }
 0x384   : > { %1985 = vst.msk [vmem:[#allocation4 + $0x28] sm:$0xff] %vm375_vm0, %v1977_v18 }
 0x388   : > { %v1997_v12 = vld [vmem:[#allocation4 + $0x30] sm:$0xff] }
 0x389   : > { %v2012_v17 = vmul.f32 %v2277_v50, %v1997_v12  ;;  %v1995_v27 = vld [vmem:[#allocation4 + $0x20] sm:$0xff] }
 0x38a   : > { %v2010_v19 = vmul.f32 %v2277_v50, %v1995_v27  ;;  %v1998_v21 = vld [vmem:[#allocation4 + $0x38] sm:$0xff] }
 0x38b   : > { %v2027_v20 = vadd.f32 %v3096_v46, %v2012_v17  ;;  %v2013_v35 = vmul.f32 %v2277_v50, %v1998_v21  ;;  %v1996_v45 = vld [vmem:[#allocation4 + $0x28] sm:$0xff] }
 0x38c   : > { %v2025_v24 = vadd.f32 %v3096_v46, %v2010_v19  ;;  %v2011_v37 = vmul.f32 %v2277_v50, %v1996_v45 }
 0x38d   : > { %v2043_v25 = vadd.f32 %v2035_v30, %v2027_v20  ;;  %v2028_v28 = vadd.f32 %v3096_v46, %v2013_v35 }
 0x38e   : > { %v2041_v33 = vadd.f32 %v2033_v34, %v2025_v24  ;;  %v2026_v22 = vadd.f32 %v3096_v46, %v2011_v37 }
 0x38f   : > { %v2051_v44 = vmax.f32 %v2043_v25, 0.0  ;;  %v2044_v39 = vadd.f32 %v2036_v32, %v2028_v28 }
 0x390   : > { %v2049_v40 = vmax.f32 %v2041_v33, 0.0  ;;  %v2042_v23 = vadd.f32 %v2034_v29, %v2026_v22 }
 0x391   : > { %v2052_v41 = vmax.f32 %v2044_v39, 0.0  ;;  %2059 = vst.msk [vmem:[%s3109_s29 + $0x30] sm:$0xff] %vm375_vm0, %v2051_v44 }
 0x392   : > { %v2050_v38 = vmax.f32 %v2042_v23, 0.0  ;;  %2057 = vst.msk [vmem:[%s3109_s29 + $0x20] sm:$0xff] %vm375_vm0, %v2049_v40 }
 0x393   : > { %2060 = vst.msk [vmem:[%s3109_s29 + $0x38] sm:$0xff] %vm375_vm0, %v2052_v41 }
 0x394   : > { %2058 = vst.msk [vmem:[%s3109_s29 + $0x28] sm:$0xff] %vm375_vm0, %v2050_v38 }
 0x395   : > { %2505 = shalt.err (!%p2502_p5)
}
 0x396   : > { %s2506_s27 = scalar_lea.hbm %s3138_s20, 1024  ;;  %s2510_s19 = scalar_lea.hbm %s3206_s10, 2048 }
 0x397   : > { %p2507_p6 = scmp.ne.s32.totalorder %s3138_s20, %s2506_s27  ;;  %p2511_p10 = scmp.lt.u32.totalorder %s3138_s20, %s3206_s10 }
 0x398   : > { %p2512_p11 = scmp.lt.u32.totalorder %s2510_s19, %s2506_s27  ;;  %p2514_p13 = scmp.lt.u32.totalorder %s2506_s27, %s3138_s20 }
 0x399   : > { %p2508_p7 = pnand %p2507_p6, %p2675_p4 }
 0x39a   : > { %p2513_p12 = por %p2512_p11, %p2511_p10 }
 0x39b   : > { %p2509_p9 = pneg %p2508_p7 }
 0x39c   : > { %p2515_p0 = por %p2514_p13, %p2513_p12 }
 0x39e   : > { %p2516_p1 = pnand %p2515_p0, %p2509_p9 }
 0x3a0   : > { %2519 = shalt.err (!%p2516_p1)
}
 0x3a1   : > { %s2578_s22 = smov 128   ;;  %s2579_s30 = smov 8  }
 0x3a2   : > { %2396 = dma.vmem_to_hbm [thread:$0]  (%p2675_p4), %s3140_s11, 1024, %s3138_s20, %s3150_s16, %s2578_s22, %s2578_s22, %s2579_s30  }
 0x3a3 PF: > { %p2402_p2 = scmp.ge.s32.totalorder %s2570_s18, 2  ;;  %s2090_s29 = sand.u32 1, %s2550_s13  }
 0x3a4   : > { %s2091_s27 = scalar_lea.sflag [#allocation6], %s2090_s29 }
 0x3a5   : > { %p2399_p3 = pnand %p2402_p2, %p2682_p8 }
 0x3a7   : > { %2545 = dma.done.wait (!%p2399_p3), %s2091_s27, 1024  }
 0x3a8   : > { %2547 = vsyncadd (!%p2399_p3), %s2091_s27, 4294966272  ;;  %s23_s18 = sadd.s32 1, %s2570_s18   ;;  %s3213_s13 = smov %s2554_s14 }
 0x3a9   : > { %p20_p5 = scmp.ge.s32.totalorder %s23_s18, 4   ;;  %s3214_s14 = smov %s2558_s15 }
 0x3aa   : > { %s3215_s15 = smov %s2688_s26  ;;  %s3216_s16 = smov %s2566_s17 }
 0x3ab   : > { %s3217_s17 = smov %s3219_s21  ;;  %22 = sbr.rel (!%p20_p5) target bundleno = 4 (0x4), region = 113 }
 0x3b2   :  { %2096 = vsyncpa [#allocation6], 1 }
 0x3b3   :  { %2098 = vsyncpa [#allocation6 + $0x1], 1 }

</bundles_post_ra>
